<compile_context>
chip_gen: v6e
topology: v6e:2x2x1
jax: 0.10.0
libtpu: 0.0.40
codegen_flags: <defaults>
</compile_context>

<pallas_src>
import functools

import jax
import jax.numpy as jnp
from jax import lax
from jax.experimental import pallas as pl
from jax.experimental.pallas import tpu as pltpu


def _mhsa_kernel(x_q_ref, x_kv_ref, wq_ref, bq_ref, wkv_ref, bkv_ref,
                 wout_ref, bout_ref, o_ref, *, num_heads, head_dim, kv_tile):
    """Fused MHSA forward for one (batch, q-tile) grid step.

    x_q_ref  : (1, tq, E)  rows of x that produce this step's queries
    x_kv_ref : (1, S,  E)  full-sequence x (keys/values source)
    wq_ref   : (E, E)      Q slab, 1/sqrt(hd) pre-folded      bq_ref: (1, E)
    wkv_ref  : (E, 2E)     [K | V] slabs                       bkv_ref: (1, 2E)
    wout_ref : (E, E)                                          bout_ref: (1, E)
    o_ref    : (1, tq, E)
    """
    H, hd = num_heads, head_dim
    E = H * hd
    tq = x_q_ref.shape[1]
    S = x_kv_ref.shape[1]
    cdt = x_q_ref.dtype        # matmul operand dtype (bf16 fast path if given bf16)

    # ---- Q projection for this q-tile (scale already folded into wq/bq) ------
    x_q = x_q_ref[0]                                                       # (tq, E)
    q = lax.dot_general(x_q, wq_ref[...], (((1,), (0,)), ((), ())),
                        preferred_element_type=jnp.float32)
    q = (q + bq_ref[...]).astype(cdt)                                      # (tq, E)
    # Head-major (H, tq, hd): one relayout; everything below is head-batched.
    q = jnp.stack([q[:, h * hd:(h + 1) * hd] for h in range(H)], axis=0)

    # ---- Online softmax over kv tiles: never materializes (S, S) scores ------
    m = jnp.full((H, tq, 1), -jnp.inf, dtype=jnp.float32)
    l = jnp.zeros((H, tq, 1), dtype=jnp.float32)
    acc = jnp.zeros((H, tq, hd), dtype=jnp.float32)

    for t in range(S // kv_tile):                       # static trip count
        x_t = x_kv_ref[0, pl.ds(t * kv_tile, kv_tile), :]                  # (tk, E)
        kv = lax.dot_general(x_t, wkv_ref[...], (((1,), (0,)), ((), ())),
                             preferred_element_type=jnp.float32)
        kv = (kv + bkv_ref[...]).astype(cdt)                               # (tk, 2E)
        k = jnp.stack([kv[:, h * hd:(h + 1) * hd] for h in range(H)], axis=0)
        v = jnp.stack([kv[:, E + h * hd:E + (h + 1) * hd] for h in range(H)], axis=0)

        # Head-batched q @ k^T (contract hd, batch over heads) — no transposes.
        s = lax.dot_general(q, k, (((2,), (2,)), ((0,), (0,))),
                            preferred_element_type=jnp.float32)            # (H, tq, tk)
        m_new = jnp.maximum(m, jnp.max(s, axis=-1, keepdims=True))
        alpha = jnp.exp(m - m_new)
        p = jnp.exp(s - m_new)
        l = alpha * l + jnp.sum(p, axis=-1, keepdims=True)
        acc = alpha * acc + lax.dot_general(
            p.astype(cdt), v, (((2,), (1,)), ((0,), (0,))),
            preferred_element_type=jnp.float32)                            # (H, tq, hd)
        m = m_new

    # ---- Finalize: exact normalization + lane-dense output projection --------
    ctx = acc * pl.reciprocal(l, approx=False)                             # exact divide
    ctx = jnp.concatenate([ctx[h] for h in range(H)], axis=-1).astype(cdt)  # (tq, E)
    out = lax.dot_general(ctx, wout_ref[...], (((1,), (0,)), ((), ())),
                          preferred_element_type=jnp.float32)
    out = out + bout_ref[...]
    o_ref[0] = out.astype(o_ref.dtype)                                     # one dense store


def prepare_mhsa_params(w_qkv, b_qkv, w_out, b_out, *, num_heads, compute_dtype=None):
    """ONE-TIME parameter preparation — call at load time, not per forward.

    Expects this module's layouts (weights stored (in, out), i.e. torch weight.T):
      w_qkv (E, 3E): qkv_proj, columns in the module's per-head-interleaved
                     [q_h|k_h|v_h] order (the layout implied by
                     `qkv.reshape(B, S, H, 3*hd)` in the PyTorch forward).
      b_qkv (3E,), w_out (E, E), b_out (E,).
    NOTE: torch.nn.MultiheadAttention's in_proj is ALREADY in [Q|K|V] slab
    layout and must NOT be permuted like this.
    """
    E = w_out.shape[0]
    assert w_qkv.shape == (E, 3 * E) and b_qkv.shape == (3 * E,)
    assert w_out.shape == (E, E) and b_out.shape == (E,)
    assert E % num_heads == 0, "embed_dim must be divisible by num_heads"
    hd = E // num_heads
    scale = hd ** -0.5

    w = w_qkv.reshape(E, num_heads, 3, hd)
    b = b_qkv.reshape(num_heads, 3, hd)
    w_q = (w[:, :, 0, :] * scale).reshape(E, E)          # scale folded into Q
    b_q = (b[:, 0, :] * scale).reshape(1, E)
    w_kv = jnp.concatenate([w[:, :, 1, :].reshape(E, E),
                            w[:, :, 2, :].reshape(E, E)], axis=1)   # (E, 2E)
    b_kv = jnp.concatenate([b[:, 1, :].reshape(1, E),
                            b[:, 2, :].reshape(1, E)], axis=1)      # (1, 2E)
    w_o = w_out
    b_o = b_out.reshape(1, E)

    if compute_dtype is not None:   # optional bf16 fast path for f32 checkpoints
        w_q, w_kv, w_o = (a.astype(compute_dtype) for a in (w_q, w_kv, w_o))
    return (w_q, b_q, w_kv, b_kv, w_o, b_o)


def _pick_q_tile(S):
    # >= 2 parallel q-tiles (both v7x TensorCores) once S is large enough,
    # while capping the per-q-tile K/V-projection recompute at 2x.
    if S >= 512 and S % 256 == 0:
        return max(256, S // 2)
    return S


def _pick_kv_tile(S):
    # Bound the live (H, tq, kv_tile) f32 score block instead of (S, S) per head.
    for t in (512, 256, 128):
        if S % t == 0:
            return t
    return S


def multi_head_self_attention(x, params, *, num_heads):
    """x: (B, S, E); params: output of prepare_mhsa_params."""
    w_q, b_q, w_kv, b_kv, w_out, b_o = params
    B, S, E = x.shape
    assert E == w_out.shape[0] and E % num_heads == 0
    hd = E // num_heads
    if x.dtype != w_q.dtype:
        x = x.astype(w_q.dtype)

    q_tile = _pick_q_tile(S)
    kv_tile = _pick_kv_tile(S)
    num_q_tiles = S // q_tile

    kernel = functools.partial(_mhsa_kernel, num_heads=num_heads, head_dim=hd,
                               kv_tile=kv_tile)

    # VMEM budget: capacity minus headroom (v7x 64 MiB/TC vs v5e/v6e 128 MiB).
    try:
        vmem_cap = int(pltpu.get_tpu_info().vmem_capacity_bytes)
    except Exception:
        vmem_cap = 64 * 2 ** 20
    vmem_limit = int(max(vmem_cap - 16 * 2 ** 20, 32 * 2 ** 20))

    def run(single_buffer_weights):
        def w_spec(shape):
            idx = lambda b, qi: (0,) * len(shape)
            if single_buffer_weights:
                # Grid-invariant weights: don't waste VMEM double-buffering them.
                return pl.BlockSpec(shape, idx, pipeline_mode=pl.Buffered(1))
            return pl.BlockSpec(shape, idx)

        grid_spec = pltpu.PrefetchScalarGridSpec(
            num_scalar_prefetch=0,
            grid=(B, num_q_tiles),
            in_specs=[
                pl.BlockSpec((1, q_tile, E), lambda b, qi: (b, qi, 0)),  # x (q rows)
                pl.BlockSpec((1, S, E), lambda b, qi: (b, 0, 0)),        # x (kv rows)
                w_spec((E, E)),          # W_q (scaled)
                w_spec((1, E)),          # b_q (scaled)
                w_spec((E, 2 * E)),      # W_kv  [K | V]
                w_spec((1, 2 * E)),      # b_kv
                w_spec((E, E)),          # W_out
                w_spec((1, E)),          # b_out
            ],
            out_specs=pl.BlockSpec((1, q_tile, E), lambda b, qi: (b, qi, 0)),
        )
        return pl.pallas_call(
            kernel,
            out_shape=jax.ShapeDtypeStruct((B, S, E), x.dtype),
            grid_spec=grid_spec,
            compiler_params=pltpu.CompilerParams(
                dimension_semantics=("parallel", "parallel"),
                vmem_limit_bytes=vmem_limit),
        )(x, x, w_q, b_q, w_kv, b_kv, w_out, b_o)

    try:
        return run(True)
    except Exception:
        # Fallback if this JAX version rejects pipeline_mode=pl.Buffered(1).
        return run(False)


def reference_mhsa(x, w_qkv, b_qkv, w_out, b_out, *, num_heads):
    """Pure-JAX reference mirroring the PyTorch forward."""
    B, S, E = x.shape
    hd = E // num_heads
    qkv = jnp.einsum("bse,ef->bsf", x, w_qkv) + b_qkv               # (B, S, 3E)
    qkv = qkv.reshape(B, S, num_heads, 3 * hd).transpose(0, 2, 1, 3)
    q, k, v = qkv[..., :hd], qkv[..., hd:2 * hd], qkv[..., 2 * hd:]
    scale = hd ** (-0.5)
    scores = jnp.einsum("bhqd,bhkd->bhqk", q, k) * scale
    w = jax.nn.softmax(scores, axis=-1)
    ctx = jnp.einsum("bhqk,bhkd->bhqd", w, v)
    ctx = ctx.transpose(0, 2, 1, 3).reshape(B, S, E)
    return jnp.einsum("bse,ef->bsf", ctx, w_out) + b_out


if __name__ == "__main__":
    B, S, E, H = 2, 8, 32, 4

    key = jax.random.PRNGKey(0)
    k_x, k_wq, k_bq, k_wo, k_bo = jax.random.split(key, 5)

    x = jax.random.normal(k_x, (B, S, E), dtype=jnp.float32)
    # Synthetic params; shapes from nn.Linear(E, 3E) / nn.Linear(E, E), stored (in, out).
    w_qkv = jax.random.normal(k_wq, (E, 3 * E), dtype=jnp.float32) * (E ** -0.5)
    b_qkv = jax.random.normal(k_bq, (3 * E,), dtype=jnp.float32) * 0.01
    w_out = jax.random.normal(k_wo, (E, E), dtype=jnp.float32) * (E ** -0.5)
    b_out = jax.random.normal(k_bo, (E,), dtype=jnp.float32) * 0.01

    # One-time weight preparation (outside the forward path), then the forward.
    params = prepare_mhsa_params(w_qkv, b_qkv, w_out, b_out, num_heads=H)
    out = multi_head_self_attention(x, params, num_heads=H)
    out = jax.block_until_ready(out)

    ref = reference_mhsa(x, w_qkv, b_qkv, w_out, b_out, num_heads=H)
    assert out.shape == (B, S, E)
    # Softmax normalization is exact now; remaining slack only covers the
    # default-precision f32 MXU matmul difference between Pallas and the XLA ref.
    assert jnp.allclose(out, ref, atol=3e-3, rtol=3e-3), "mismatch vs JAX reference"

    print("KERNEL_OK")
</pallas_src>

<mosaic_0001>
module attributes {stable_mosaic.version = 11 : i64} {
  func.func @_mhsa_kernel(%arg0: i32, %arg1: i32, %arg2: memref<1x8x32xf32, #tpu.memory_space<vmem>>, %arg3: memref<1x8x32xf32, #tpu.memory_space<vmem>>, %arg4: memref<32x32xf32, #tpu.memory_space<vmem>>, %arg5: memref<1x32xf32, #tpu.memory_space<vmem>>, %arg6: memref<32x64xf32, #tpu.memory_space<vmem>>, %arg7: memref<1x64xf32, #tpu.memory_space<vmem>>, %arg8: memref<32x32xf32, #tpu.memory_space<vmem>>, %arg9: memref<1x32xf32, #tpu.memory_space<vmem>>, %arg10: memref<1x8x32xf32, #tpu.memory_space<vmem>>) attributes {dimension_semantics = [#tpu.dimension_semantics<parallel>, #tpu.dimension_semantics<parallel>], iteration_bounds = array<i64: 2, 1>, scalar_prefetch = 0 : i64, scratch_operands = 0 : i64, tpu.core_type = #tpu.core_type<tc>, window_params = [{transform_indices = @transform_0, window_bounds = array<i64: 1, 8, 32>}, {transform_indices = @transform_1, window_bounds = array<i64: 1, 8, 32>}, {pipeline_mode = #tpu.pipeline_mode<synchronous>, transform_indices = @transform_2, window_bounds = array<i64: 32, 32>}, {pipeline_mode = #tpu.pipeline_mode<synchronous>, transform_indices = @transform_3, window_bounds = array<i64: 1, 32>}, {pipeline_mode = #tpu.pipeline_mode<synchronous>, transform_indices = @transform_4, window_bounds = array<i64: 32, 64>}, {pipeline_mode = #tpu.pipeline_mode<synchronous>, transform_indices = @transform_5, window_bounds = array<i64: 1, 64>}, {pipeline_mode = #tpu.pipeline_mode<synchronous>, transform_indices = @transform_6, window_bounds = array<i64: 32, 32>}, {pipeline_mode = #tpu.pipeline_mode<synchronous>, transform_indices = @transform_7, window_bounds = array<i64: 1, 32>}, {transform_indices = @transform_8, window_bounds = array<i64: 1, 8, 32>}]} {
    %c0 = arith.constant 0 : index
    %c0_0 = arith.constant 0 : index
    %c0_1 = arith.constant 0 : index
    %0 = vector.load %arg2[%c0, %c0_0, %c0_1] : memref<1x8x32xf32, #tpu.memory_space<vmem>>, vector<1x8x32xf32>
    %1 = vector.shape_cast %0 : vector<1x8x32xf32> to vector<8x32xf32>
    %c0_2 = arith.constant 0 : index
    %c0_3 = arith.constant 0 : index
    %2 = vector.load %arg4[%c0_2, %c0_3] : memref<32x32xf32, #tpu.memory_space<vmem>>, vector<32x32xf32>
    %cst = arith.constant dense<0.000000e+00> : vector<8x32xf32>
    %3 = tpu.matmul %1, %2, %cst {dimension_numbers = #tpu.dot_dimension_numbers<[1], [0], [0], [1], [0, 0, 1, 1], [], []>} : vector<8x32xf32>, vector<32x32xf32>, vector<8x32xf32> -> vector<8x32xf32>
    %c0_4 = arith.constant 0 : index
    %c0_5 = arith.constant 0 : index
    %4 = vector.load %arg5[%c0_4, %c0_5] : memref<1x32xf32, #tpu.memory_space<vmem>>, vector<1x32xf32>
    %5 = vector.broadcast %4 : vector<1x32xf32> to vector<8x32xf32>
    %6 = arith.addf %3, %5 : vector<8x32xf32>
    %7 = vector.extract_strided_slice %6 {offsets = [0, 0], sizes = [8, 8], strides = [1, 1]} : vector<8x32xf32> to vector<8x8xf32>
    %8 = vector.extract_strided_slice %6 {offsets = [0, 8], sizes = [8, 8], strides = [1, 1]} : vector<8x32xf32> to vector<8x8xf32>
    %9 = vector.extract_strided_slice %6 {offsets = [0, 16], sizes = [8, 8], strides = [1, 1]} : vector<8x32xf32> to vector<8x8xf32>
    %10 = vector.extract_strided_slice %6 {offsets = [0, 24], sizes = [8, 8], strides = [1, 1]} : vector<8x32xf32> to vector<8x8xf32>
    %11 = vector.shape_cast %7 : vector<8x8xf32> to vector<1x8x8xf32>
    %12 = vector.shape_cast %8 : vector<8x8xf32> to vector<1x8x8xf32>
    %13 = vector.shape_cast %9 : vector<8x8xf32> to vector<1x8x8xf32>
    %14 = vector.shape_cast %10 : vector<8x8xf32> to vector<1x8x8xf32>
    %15 = tpu.concatenate %11, %12, %13, %14 in 0 : vector<1x8x8xf32>, vector<1x8x8xf32>, vector<1x8x8xf32>, vector<1x8x8xf32> -> vector<4x8x8xf32>
    %cst_6 = arith.constant 0xFF800000 : f32
    %16 = vector.broadcast %cst_6 : f32 to vector<4x8x1xf32>
    %cst_7 = arith.constant 0.000000e+00 : f32
    %17 = vector.broadcast %cst_7 : f32 to vector<4x8x1xf32>
    %cst_8 = arith.constant 0.000000e+00 : f32
    %18 = vector.broadcast %cst_8 : f32 to vector<4x8x8xf32>
    %c0_9 = arith.constant 0 : index
    %c0_10 = arith.constant 0 : index
    %c0_11 = arith.constant 0 : index
    %19 = vector.load %arg3[%c0_9, %c0_10, %c0_11] : memref<1x8x32xf32, #tpu.memory_space<vmem>>, vector<1x8x32xf32>
    %20 = vector.shape_cast %19 : vector<1x8x32xf32> to vector<8x32xf32>
    %c0_12 = arith.constant 0 : index
    %c0_13 = arith.constant 0 : index
    %21 = vector.load %arg6[%c0_12, %c0_13] : memref<32x64xf32, #tpu.memory_space<vmem>>, vector<32x64xf32>
    %cst_14 = arith.constant dense<0.000000e+00> : vector<8x64xf32>
    %22 = tpu.matmul %20, %21, %cst_14 {dimension_numbers = #tpu.dot_dimension_numbers<[1], [0], [0], [1], [0, 0, 1, 1], [], []>} : vector<8x32xf32>, vector<32x64xf32>, vector<8x64xf32> -> vector<8x64xf32>
    %c0_15 = arith.constant 0 : index
    %c0_16 = arith.constant 0 : index
    %23 = vector.load %arg7[%c0_15, %c0_16] : memref<1x64xf32, #tpu.memory_space<vmem>>, vector<1x64xf32>
    %24 = vector.broadcast %23 : vector<1x64xf32> to vector<8x64xf32>
    %25 = arith.addf %22, %24 : vector<8x64xf32>
    %26 = vector.extract_strided_slice %25 {offsets = [0, 0], sizes = [8, 8], strides = [1, 1]} : vector<8x64xf32> to vector<8x8xf32>
    %27 = vector.extract_strided_slice %25 {offsets = [0, 8], sizes = [8, 8], strides = [1, 1]} : vector<8x64xf32> to vector<8x8xf32>
    %28 = vector.extract_strided_slice %25 {offsets = [0, 16], sizes = [8, 8], strides = [1, 1]} : vector<8x64xf32> to vector<8x8xf32>
    %29 = vector.extract_strided_slice %25 {offsets = [0, 24], sizes = [8, 8], strides = [1, 1]} : vector<8x64xf32> to vector<8x8xf32>
    %30 = vector.shape_cast %26 : vector<8x8xf32> to vector<1x8x8xf32>
    %31 = vector.shape_cast %27 : vector<8x8xf32> to vector<1x8x8xf32>
    %32 = vector.shape_cast %28 : vector<8x8xf32> to vector<1x8x8xf32>
    %33 = vector.shape_cast %29 : vector<8x8xf32> to vector<1x8x8xf32>
    %34 = tpu.concatenate %30, %31, %32, %33 in 0 : vector<1x8x8xf32>, vector<1x8x8xf32>, vector<1x8x8xf32>, vector<1x8x8xf32> -> vector<4x8x8xf32>
    %35 = vector.extract_strided_slice %25 {offsets = [0, 32], sizes = [8, 8], strides = [1, 1]} : vector<8x64xf32> to vector<8x8xf32>
    %36 = vector.extract_strided_slice %25 {offsets = [0, 40], sizes = [8, 8], strides = [1, 1]} : vector<8x64xf32> to vector<8x8xf32>
    %37 = vector.extract_strided_slice %25 {offsets = [0, 48], sizes = [8, 8], strides = [1, 1]} : vector<8x64xf32> to vector<8x8xf32>
    %38 = vector.extract_strided_slice %25 {offsets = [0, 56], sizes = [8, 8], strides = [1, 1]} : vector<8x64xf32> to vector<8x8xf32>
    %39 = vector.shape_cast %35 : vector<8x8xf32> to vector<1x8x8xf32>
    %40 = vector.shape_cast %36 : vector<8x8xf32> to vector<1x8x8xf32>
    %41 = vector.shape_cast %37 : vector<8x8xf32> to vector<1x8x8xf32>
    %42 = vector.shape_cast %38 : vector<8x8xf32> to vector<1x8x8xf32>
    %43 = tpu.concatenate %39, %40, %41, %42 in 0 : vector<1x8x8xf32>, vector<1x8x8xf32>, vector<1x8x8xf32>, vector<1x8x8xf32> -> vector<4x8x8xf32>
    %cst_17 = arith.constant dense<0.000000e+00> : vector<4x8x8xf32>
    %44 = tpu.matmul %15, %34, %cst_17 {dimension_numbers = #tpu.dot_dimension_numbers<[2], [2], [1], [1], [0, 0, 0, 1, 1, 1], [0], [0]>} : vector<4x8x8xf32>, vector<4x8x8xf32>, vector<4x8x8xf32> -> vector<4x8x8xf32>
    %cst_18 = arith.constant dense<0xFF800000> : vector<4x8xf32>
    %45 = vector.multi_reduction <maximumf>, %44, %cst_18 [2] : vector<4x8x8xf32> to vector<4x8xf32>
    %46 = vector.shape_cast %45 : vector<4x8xf32> to vector<4x8x1xf32>
    %47 = arith.maximumf %16, %46 : vector<4x8x1xf32>
    %48 = arith.subf %16, %47 : vector<4x8x1xf32>
    %49 = math.exp %48 : vector<4x8x1xf32>
    %50 = vector.broadcast %47 : vector<4x8x1xf32> to vector<4x8x8xf32>
    %51 = arith.subf %44, %50 : vector<4x8x8xf32>
    %52 = math.exp %51 : vector<4x8x8xf32>
    %53 = arith.mulf %49, %17 : vector<4x8x1xf32>
    %cst_19 = arith.constant dense<0.000000e+00> : vector<4x8xf32>
    %54 = vector.multi_reduction <add>, %52, %cst_19 [2] : vector<4x8x8xf32> to vector<4x8xf32>
    %55 = vector.shape_cast %54 : vector<4x8xf32> to vector<4x8x1xf32>
    %56 = arith.addf %53, %55 : vector<4x8x1xf32>
    %57 = vector.broadcast %49 : vector<4x8x1xf32> to vector<4x8x8xf32>
    %58 = arith.mulf %57, %18 : vector<4x8x8xf32>
    %cst_20 = arith.constant dense<0.000000e+00> : vector<4x8x8xf32>
    %59 = tpu.matmul %52, %43, %cst_20 {dimension_numbers = #tpu.dot_dimension_numbers<[2], [1], [1], [2], [0, 0, 0, 1, 1, 2], [0], [0]>} : vector<4x8x8xf32>, vector<4x8x8xf32>, vector<4x8x8xf32> -> vector<4x8x8xf32>
    %60 = arith.addf %58, %59 : vector<4x8x8xf32>
    %61 = tpu.reciprocal %56 : vector<4x8x1xf32> -> vector<4x8x1xf32>
    %62 = vector.broadcast %61 : vector<4x8x1xf32> to vector<4x8x8xf32>
    %63 = arith.mulf %60, %62 : vector<4x8x8xf32>
    %64 = vector.extract_strided_slice %63 {offsets = [0, 0, 0], sizes = [1, 8, 8], strides = [1, 1, 1]} : vector<4x8x8xf32> to vector<1x8x8xf32>
    %65 = vector.shape_cast %64 : vector<1x8x8xf32> to vector<8x8xf32>
    %66 = vector.extract_strided_slice %63 {offsets = [1, 0, 0], sizes = [1, 8, 8], strides = [1, 1, 1]} : vector<4x8x8xf32> to vector<1x8x8xf32>
    %67 = vector.shape_cast %66 : vector<1x8x8xf32> to vector<8x8xf32>
    %68 = vector.extract_strided_slice %63 {offsets = [2, 0, 0], sizes = [1, 8, 8], strides = [1, 1, 1]} : vector<4x8x8xf32> to vector<1x8x8xf32>
    %69 = vector.shape_cast %68 : vector<1x8x8xf32> to vector<8x8xf32>
    %70 = vector.extract_strided_slice %63 {offsets = [3, 0, 0], sizes = [1, 8, 8], strides = [1, 1, 1]} : vector<4x8x8xf32> to vector<1x8x8xf32>
    %71 = vector.shape_cast %70 : vector<1x8x8xf32> to vector<8x8xf32>
    %72 = tpu.concatenate %65, %67, %69, %71 in 1 : vector<8x8xf32>, vector<8x8xf32>, vector<8x8xf32>, vector<8x8xf32> -> vector<8x32xf32>
    %c0_21 = arith.constant 0 : index
    %c0_22 = arith.constant 0 : index
    %73 = vector.load %arg8[%c0_21, %c0_22] : memref<32x32xf32, #tpu.memory_space<vmem>>, vector<32x32xf32>
    %cst_23 = arith.constant dense<0.000000e+00> : vector<8x32xf32>
    %74 = tpu.matmul %72, %73, %cst_23 {dimension_numbers = #tpu.dot_dimension_numbers<[1], [0], [0], [1], [0, 0, 1, 1], [], []>} : vector<8x32xf32>, vector<32x32xf32>, vector<8x32xf32> -> vector<8x32xf32>
    %c0_24 = arith.constant 0 : index
    %c0_25 = arith.constant 0 : index
    %75 = vector.load %arg9[%c0_24, %c0_25] : memref<1x32xf32, #tpu.memory_space<vmem>>, vector<1x32xf32>
    %76 = vector.broadcast %75 : vector<1x32xf32> to vector<8x32xf32>
    %77 = arith.addf %74, %76 : vector<8x32xf32>
    %c0_26 = arith.constant 0 : index
    %c0_27 = arith.constant 0 : index
    %c0_28 = arith.constant 0 : index
    %78 = vector.load %arg10[%c0_26, %c0_27, %c0_28] : memref<1x8x32xf32, #tpu.memory_space<vmem>>, vector<1x8x32xf32>
    %79 = vector.shape_cast %78 : vector<1x8x32xf32> to vector<8x32xf32>
    %80 = vector.shape_cast %77 : vector<8x32xf32> to vector<1x8x32xf32>
    tpu.vector_store %arg10[%c0_26, %c0_27, %c0_28], %80 {strides = array<i32>} : memref<1x8x32xf32, #tpu.memory_space<vmem>>, vector<1x8x32xf32>,
    return
  }
  func.func @transform_0(%arg0: i32, %arg1: i32) -> (i32, i32, i32) {
    %c0_i32 = arith.constant 0 : i32
    %c0_i32_0 = arith.constant 0 : i32
    return %arg0, %arg1, %c0_i32 : i32, i32, i32
  }
  func.func @transform_1(%arg0: i32, %arg1: i32) -> (i32, i32, i32) {
    %c0_i32 = arith.constant 0 : i32
    %c0_i32_0 = arith.constant 0 : i32
    %c0_i32_1 = arith.constant 0 : i32
    return %arg0, %c0_i32, %c0_i32_0 : i32, i32, i32
  }
  func.func @transform_2(%arg0: i32, %arg1: i32) -> (i32, i32) {
    %c0_i32 = arith.constant 0 : i32
    %c0_i32_0 = arith.constant 0 : i32
    %c0_i32_1 = arith.constant 0 : i32
    return %c0_i32, %c0_i32_0 : i32, i32
  }
  func.func @transform_3(%arg0: i32, %arg1: i32) -> (i32, i32) {
    %c0_i32 = arith.constant 0 : i32
    %c0_i32_0 = arith.constant 0 : i32
    %c0_i32_1 = arith.constant 0 : i32
    return %c0_i32, %c0_i32_0 : i32, i32
  }
  func.func @transform_4(%arg0: i32, %arg1: i32) -> (i32, i32) {
    %c0_i32 = arith.constant 0 : i32
    %c0_i32_0 = arith.constant 0 : i32
    %c0_i32_1 = arith.constant 0 : i32
    return %c0_i32, %c0_i32_0 : i32, i32
  }
  func.func @transform_5(%arg0: i32, %arg1: i32) -> (i32, i32) {
    %c0_i32 = arith.constant 0 : i32
    %c0_i32_0 = arith.constant 0 : i32
    %c0_i32_1 = arith.constant 0 : i32
    return %c0_i32, %c0_i32_0 : i32, i32
  }
  func.func @transform_6(%arg0: i32, %arg1: i32) -> (i32, i32) {
    %c0_i32 = arith.constant 0 : i32
    %c0_i32_0 = arith.constant 0 : i32
    %c0_i32_1 = arith.constant 0 : i32
    return %c0_i32, %c0_i32_0 : i32, i32
  }
  func.func @transform_7(%arg0: i32, %arg1: i32) -> (i32, i32) {
    %c0_i32 = arith.constant 0 : i32
    %c0_i32_0 = arith.constant 0 : i32
    %c0_i32_1 = arith.constant 0 : i32
    return %c0_i32, %c0_i32_0 : i32, i32
  }
  func.func @transform_8(%arg0: i32, %arg1: i32) -> (i32, i32, i32) {
    %c0_i32 = arith.constant 0 : i32
    %c0_i32_0 = arith.constant 0 : i32
    return %arg0, %arg1, %c0_i32 : i32, i32, i32
  }
}

module attributes {stable_mosaic.version = 11 : i64} {
  func.func @_mhsa_kernel(%arg0: i32, %arg1: i32, %arg2: memref<1x8x32xf32, #tpu.memory_space<vmem>>, %arg3: memref<1x8x32xf32, #tpu.memory_space<vmem>>, %arg4: memref<32x32xf32, #tpu.memory_space<vmem>>, %arg5: memref<1x32xf32, #tpu.memory_space<vmem>>, %arg6: memref<32x64xf32, #tpu.memory_space<vmem>>, %arg7: memref<1x64xf32, #tpu.memory_space<vmem>>, %arg8: memref<32x32xf32, #tpu.memory_space<vmem>>, %arg9: memref<1x32xf32, #tpu.memory_space<vmem>>, %arg10: memref<1x8x32xf32, #tpu.memory_space<vmem>>) attributes {dimension_semantics = [#tpu.dimension_semantics<parallel>, #tpu.dimension_semantics<parallel>], iteration_bounds = array<i64: 2, 1>, scalar_prefetch = 0 : i64, scratch_operands = 0 : i64, tpu.core_type = #tpu.core_type<tc>, window_params = [{transform_indices = @transform_0, window_bounds = array<i64: 1, 8, 32>}, {transform_indices = @transform_1, window_bounds = array<i64: 1, 8, 32>}, {pipeline_mode = #tpu.pipeline_mode<synchronous>, transform_indices = @transform_2, window_bounds = array<i64: 32, 32>}, {pipeline_mode = #tpu.pipeline_mode<synchronous>, transform_indices = @transform_3, window_bounds = array<i64: 1, 32>}, {pipeline_mode = #tpu.pipeline_mode<synchronous>, transform_indices = @transform_4, window_bounds = array<i64: 32, 64>}, {pipeline_mode = #tpu.pipeline_mode<synchronous>, transform_indices = @transform_5, window_bounds = array<i64: 1, 64>}, {pipeline_mode = #tpu.pipeline_mode<synchronous>, transform_indices = @transform_6, window_bounds = array<i64: 32, 32>}, {pipeline_mode = #tpu.pipeline_mode<synchronous>, transform_indices = @transform_7, window_bounds = array<i64: 1, 32>}, {transform_indices = @transform_8, window_bounds = array<i64: 1, 8, 32>}]} {
    %c0 = arith.constant 0 : index
    %c0_0 = arith.constant 0 : index
    %c0_1 = arith.constant 0 : index
    %0 = vector.load %arg2[%c0, %c0_0, %c0_1] : memref<1x8x32xf32, #tpu.memory_space<vmem>>, vector<1x8x32xf32>
    %1 = vector.shape_cast %0 : vector<1x8x32xf32> to vector<8x32xf32>
    %c0_2 = arith.constant 0 : index
    %c0_3 = arith.constant 0 : index
    %2 = vector.load %arg4[%c0_2, %c0_3] : memref<32x32xf32, #tpu.memory_space<vmem>>, vector<32x32xf32>
    %cst = arith.constant dense<0.000000e+00> : vector<8x32xf32>
    %3 = tpu.matmul %1, %2, %cst {dimension_numbers = #tpu.dot_dimension_numbers<[1], [0], [0], [1], [0, 0, 1, 1], [], []>} : vector<8x32xf32>, vector<32x32xf32>, vector<8x32xf32> -> vector<8x32xf32>
    %c0_4 = arith.constant 0 : index
    %c0_5 = arith.constant 0 : index
    %4 = vector.load %arg5[%c0_4, %c0_5] : memref<1x32xf32, #tpu.memory_space<vmem>>, vector<1x32xf32>
    %5 = vector.broadcast %4 : vector<1x32xf32> to vector<8x32xf32>
    %6 = arith.addf %3, %5 : vector<8x32xf32>
    %7 = vector.extract_strided_slice %6 {offsets = [0, 0], sizes = [8, 8], strides = [1, 1]} : vector<8x32xf32> to vector<8x8xf32>
    %8 = vector.extract_strided_slice %6 {offsets = [0, 8], sizes = [8, 8], strides = [1, 1]} : vector<8x32xf32> to vector<8x8xf32>
    %9 = vector.extract_strided_slice %6 {offsets = [0, 16], sizes = [8, 8], strides = [1, 1]} : vector<8x32xf32> to vector<8x8xf32>
    %10 = vector.extract_strided_slice %6 {offsets = [0, 24], sizes = [8, 8], strides = [1, 1]} : vector<8x32xf32> to vector<8x8xf32>
    %11 = vector.shape_cast %7 : vector<8x8xf32> to vector<1x8x8xf32>
    %12 = vector.shape_cast %8 : vector<8x8xf32> to vector<1x8x8xf32>
    %13 = vector.shape_cast %9 : vector<8x8xf32> to vector<1x8x8xf32>
    %14 = vector.shape_cast %10 : vector<8x8xf32> to vector<1x8x8xf32>
    %15 = tpu.concatenate %11, %12, %13, %14 in 0 : vector<1x8x8xf32>, vector<1x8x8xf32>, vector<1x8x8xf32>, vector<1x8x8xf32> -> vector<4x8x8xf32>
    %cst_6 = arith.constant 0xFF800000 : f32
    %16 = vector.broadcast %cst_6 : f32 to vector<4x8x1xf32>
    %cst_7 = arith.constant 0.000000e+00 : f32
    %17 = vector.broadcast %cst_7 : f32 to vector<4x8x1xf32>
    %cst_8 = arith.constant 0.000000e+00 : f32
    %18 = vector.broadcast %cst_8 : f32 to vector<4x8x8xf32>
    %c0_9 = arith.constant 0 : index
    %c0_10 = arith.constant 0 : index
    %c0_11 = arith.constant 0 : index
    %19 = vector.load %arg3[%c0_9, %c0_10, %c0_11] : memref<1x8x32xf32, #tpu.memory_space<vmem>>, vector<1x8x32xf32>
    %20 = vector.shape_cast %19 : vector<1x8x32xf32> to vector<8x32xf32>
    %c0_12 = arith.constant 0 : index
    %c0_13 = arith.constant 0 : index
    %21 = vector.load %arg6[%c0_12, %c0_13] : memref<32x64xf32, #tpu.memory_space<vmem>>, vector<32x64xf32>
    %cst_14 = arith.constant dense<0.000000e+00> : vector<8x64xf32>
    %22 = tpu.matmul %20, %21, %cst_14 {dimension_numbers = #tpu.dot_dimension_numbers<[1], [0], [0], [1], [0, 0, 1, 1], [], []>} : vector<8x32xf32>, vector<32x64xf32>, vector<8x64xf32> -> vector<8x64xf32>
    %c0_15 = arith.constant 0 : index
    %c0_16 = arith.constant 0 : index
    %23 = vector.load %arg7[%c0_15, %c0_16] : memref<1x64xf32, #tpu.memory_space<vmem>>, vector<1x64xf32>
    %24 = vector.broadcast %23 : vector<1x64xf32> to vector<8x64xf32>
    %25 = arith.addf %22, %24 : vector<8x64xf32>
    %26 = vector.extract_strided_slice %25 {offsets = [0, 0], sizes = [8, 8], strides = [1, 1]} : vector<8x64xf32> to vector<8x8xf32>
    %27 = vector.extract_strided_slice %25 {offsets = [0, 8], sizes = [8, 8], strides = [1, 1]} : vector<8x64xf32> to vector<8x8xf32>
    %28 = vector.extract_strided_slice %25 {offsets = [0, 16], sizes = [8, 8], strides = [1, 1]} : vector<8x64xf32> to vector<8x8xf32>
    %29 = vector.extract_strided_slice %25 {offsets = [0, 24], sizes = [8, 8], strides = [1, 1]} : vector<8x64xf32> to vector<8x8xf32>
    %30 = vector.shape_cast %26 : vector<8x8xf32> to vector<1x8x8xf32>
    %31 = vector.shape_cast %27 : vector<8x8xf32> to vector<1x8x8xf32>
    %32 = vector.shape_cast %28 : vector<8x8xf32> to vector<1x8x8xf32>
    %33 = vector.shape_cast %29 : vector<8x8xf32> to vector<1x8x8xf32>
    %34 = tpu.concatenate %30, %31, %32, %33 in 0 : vector<1x8x8xf32>, vector<1x8x8xf32>, vector<1x8x8xf32>, vector<1x8x8xf32> -> vector<4x8x8xf32>
    %35 = vector.extract_strided_slice %25 {offsets = [0, 32], sizes = [8, 8], strides = [1, 1]} : vector<8x64xf32> to vector<8x8xf32>
    %36 = vector.extract_strided_slice %25 {offsets = [0, 40], sizes = [8, 8], strides = [1, 1]} : vector<8x64xf32> to vector<8x8xf32>
    %37 = vector.extract_strided_slice %25 {offsets = [0, 48], sizes = [8, 8], strides = [1, 1]} : vector<8x64xf32> to vector<8x8xf32>
    %38 = vector.extract_strided_slice %25 {offsets = [0, 56], sizes = [8, 8], strides = [1, 1]} : vector<8x64xf32> to vector<8x8xf32>
    %39 = vector.shape_cast %35 : vector<8x8xf32> to vector<1x8x8xf32>
    %40 = vector.shape_cast %36 : vector<8x8xf32> to vector<1x8x8xf32>
    %41 = vector.shape_cast %37 : vector<8x8xf32> to vector<1x8x8xf32>
    %42 = vector.shape_cast %38 : vector<8x8xf32> to vector<1x8x8xf32>
    %43 = tpu.concatenate %39, %40, %41, %42 in 0 : vector<1x8x8xf32>, vector<1x8x8xf32>, vector<1x8x8xf32>, vector<1x8x8xf32> -> vector<4x8x8xf32>
    %cst_17 = arith.constant dense<0.000000e+00> : vector<4x8x8xf32>
    %44 = tpu.matmul %15, %34, %cst_17 {dimension_numbers = #tpu.dot_dimension_numbers<[2], [2], [1], [1], [0, 0, 0, 1, 1, 1], [0], [0]>} : vector<4x8x8xf32>, vector<4x8x8xf32>, vector<4x8x8xf32> -> vector<4x8x8xf32>
    %cst_18 = arith.constant dense<0xFF800000> : vector<4x8xf32>
    %45 = vector.multi_reduction <maximumf>, %44, %cst_18 [2] : vector<4x8x8xf32> to vector<4x8xf32>
    %46 = vector.shape_cast %45 : vector<4x8xf32> to vector<4x8x1xf32>
    %47 = arith.maximumf %16, %46 : vector<4x8x1xf32>
    %48 = arith.subf %16, %47 : vector<4x8x1xf32>
    %49 = math.exp %48 : vector<4x8x1xf32>
    %50 = vector.broadcast %47 : vector<4x8x1xf32> to vector<4x8x8xf32>
    %51 = arith.subf %44, %50 : vector<4x8x8xf32>
    %52 = math.exp %51 : vector<4x8x8xf32>
    %53 = arith.mulf %49, %17 : vector<4x8x1xf32>
    %cst_19 = arith.constant dense<0.000000e+00> : vector<4x8xf32>
    %54 = vector.multi_reduction <add>, %52, %cst_19 [2] : vector<4x8x8xf32> to vector<4x8xf32>
    %55 = vector.shape_cast %54 : vector<4x8xf32> to vector<4x8x1xf32>
    %56 = arith.addf %53, %55 : vector<4x8x1xf32>
    %57 = vector.broadcast %49 : vector<4x8x1xf32> to vector<4x8x8xf32>
    %58 = arith.mulf %57, %18 : vector<4x8x8xf32>
    %cst_20 = arith.constant dense<0.000000e+00> : vector<4x8x8xf32>
    %59 = tpu.matmul %52, %43, %cst_20 {dimension_numbers = #tpu.dot_dimension_numbers<[2], [1], [1], [2], [0, 0, 0, 1, 1, 2], [0], [0]>} : vector<4x8x8xf32>, vector<4x8x8xf32>, vector<4x8x8xf32> -> vector<4x8x8xf32>
    %60 = arith.addf %58, %59 : vector<4x8x8xf32>
    %61 = tpu.reciprocal %56 : vector<4x8x1xf32> -> vector<4x8x1xf32>
    %62 = vector.broadcast %61 : vector<4x8x1xf32> to vector<4x8x8xf32>
    %63 = arith.mulf %60, %62 : vector<4x8x8xf32>
    %64 = vector.extract_strided_slice %63 {offsets = [0, 0, 0], sizes = [1, 8, 8], strides = [1, 1, 1]} : vector<4x8x8xf32> to vector<1x8x8xf32>
    %65 = vector.shape_cast %64 : vector<1x8x8xf32> to vector<8x8xf32>
    %66 = vector.extract_strided_slice %63 {offsets = [1, 0, 0], sizes = [1, 8, 8], strides = [1, 1, 1]} : vector<4x8x8xf32> to vector<1x8x8xf32>
    %67 = vector.shape_cast %66 : vector<1x8x8xf32> to vector<8x8xf32>
    %68 = vector.extract_strided_slice %63 {offsets = [2, 0, 0], sizes = [1, 8, 8], strides = [1, 1, 1]} : vector<4x8x8xf32> to vector<1x8x8xf32>
    %69 = vector.shape_cast %68 : vector<1x8x8xf32> to vector<8x8xf32>
    %70 = vector.extract_strided_slice %63 {offsets = [3, 0, 0], sizes = [1, 8, 8], strides = [1, 1, 1]} : vector<4x8x8xf32> to vector<1x8x8xf32>
    %71 = vector.shape_cast %70 : vector<1x8x8xf32> to vector<8x8xf32>
    %72 = tpu.concatenate %65, %67, %69, %71 in 1 : vector<8x8xf32>, vector<8x8xf32>, vector<8x8xf32>, vector<8x8xf32> -> vector<8x32xf32>
    %c0_21 = arith.constant 0 : index
    %c0_22 = arith.constant 0 : index
    %73 = vector.load %arg8[%c0_21, %c0_22] : memref<32x32xf32, #tpu.memory_space<vmem>>, vector<32x32xf32>
    %cst_23 = arith.constant dense<0.000000e+00> : vector<8x32xf32>
    %74 = tpu.matmul %72, %73, %cst_23 {dimension_numbers = #tpu.dot_dimension_numbers<[1], [0], [0], [1], [0, 0, 1, 1], [], []>} : vector<8x32xf32>, vector<32x32xf32>, vector<8x32xf32> -> vector<8x32xf32>
    %c0_24 = arith.constant 0 : index
    %c0_25 = arith.constant 0 : index
    %75 = vector.load %arg9[%c0_24, %c0_25] : memref<1x32xf32, #tpu.memory_space<vmem>>, vector<1x32xf32>
    %76 = vector.broadcast %75 : vector<1x32xf32> to vector<8x32xf32>
    %77 = arith.addf %74, %76 : vector<8x32xf32>
    %c0_26 = arith.constant 0 : index
    %c0_27 = arith.constant 0 : index
    %c0_28 = arith.constant 0 : index
    %78 = vector.load %arg10[%c0_26, %c0_27, %c0_28] : memref<1x8x32xf32, #tpu.memory_space<vmem>>, vector<1x8x32xf32>
    %79 = vector.shape_cast %78 : vector<1x8x32xf32> to vector<8x32xf32>
    %80 = vector.shape_cast %77 : vector<8x32xf32> to vector<1x8x32xf32>
    tpu.vector_store %arg10[%c0_26, %c0_27, %c0_28], %80 {strides = array<i32>} : memref<1x8x32xf32, #tpu.memory_space<vmem>>, vector<1x8x32xf32>,
    return
  }
  func.func @transform_0(%arg0: i32, %arg1: i32) -> (i32, i32, i32) {
    %c0_i32 = arith.constant 0 : i32
    %c0_i32_0 = arith.constant 0 : i32
    return %arg0, %arg1, %c0_i32 : i32, i32, i32
  }
  func.func @transform_1(%arg0: i32, %arg1: i32) -> (i32, i32, i32) {
    %c0_i32 = arith.constant 0 : i32
    %c0_i32_0 = arith.constant 0 : i32
    %c0_i32_1 = arith.constant 0 : i32
    return %arg0, %c0_i32, %c0_i32_0 : i32, i32, i32
  }
  func.func @transform_2(%arg0: i32, %arg1: i32) -> (i32, i32) {
    %c0_i32 = arith.constant 0 : i32
    %c0_i32_0 = arith.constant 0 : i32
    %c0_i32_1 = arith.constant 0 : i32
    return %c0_i32, %c0_i32_0 : i32, i32
  }
  func.func @transform_3(%arg0: i32, %arg1: i32) -> (i32, i32) {
    %c0_i32 = arith.constant 0 : i32
    %c0_i32_0 = arith.constant 0 : i32
    %c0_i32_1 = arith.constant 0 : i32
    return %c0_i32, %c0_i32_0 : i32, i32
  }
  func.func @transform_4(%arg0: i32, %arg1: i32) -> (i32, i32) {
    %c0_i32 = arith.constant 0 : i32
    %c0_i32_0 = arith.constant 0 : i32
    %c0_i32_1 = arith.constant 0 : i32
    return %c0_i32, %c0_i32_0 : i32, i32
  }
  func.func @transform_5(%arg0: i32, %arg1: i32) -> (i32, i32) {
    %c0_i32 = arith.constant 0 : i32
    %c0_i32_0 = arith.constant 0 : i32
    %c0_i32_1 = arith.constant 0 : i32
    return %c0_i32, %c0_i32_0 : i32, i32
  }
  func.func @transform_6(%arg0: i32, %arg1: i32) -> (i32, i32) {
    %c0_i32 = arith.constant 0 : i32
    %c0_i32_0 = arith.constant 0 : i32
    %c0_i32_1 = arith.constant 0 : i32
    return %c0_i32, %c0_i32_0 : i32, i32
  }
  func.func @transform_7(%arg0: i32, %arg1: i32) -> (i32, i32) {
    %c0_i32 = arith.constant 0 : i32
    %c0_i32_0 = arith.constant 0 : i32
    %c0_i32_1 = arith.constant 0 : i32
    return %c0_i32, %c0_i32_0 : i32, i32
  }
  func.func @transform_8(%arg0: i32, %arg1: i32) -> (i32, i32, i32) {
    %c0_i32 = arith.constant 0 : i32
    %c0_i32_0 = arith.constant 0 : i32
    return %arg0, %arg1, %c0_i32 : i32, i32, i32
  }
}

</mosaic_0001>

<bundles_post_ra>
// kernel: tpu_custom_call.1
= control target key start
LH: loop header
LB: loop body
LE: loop exit
PB: predicated region body
PF: predicated region fallthrough
CT: control target
= control target key end

     0   :  { %s2391_s0 = inlined_call_operand.hbm [shape: f32[2,8,32], index: 0, kind: input, shape index: {}]   ;;  %s2392_s1 = inlined_call_operand.hbm [shape: f32[2,8,32], index: 1, kind: input, shape index: {}]   ;;  %s2393_s2 = inlined_call_operand.hbm [shape: f32[32,32], index: 2, kind: input, shape index: {}]   ;;  %s2394_s3 = inlined_call_operand.vmem [shape: f32[1,32], index: 3, kind: input, shape index: {}]   ;;  %s2395_s4 = inlined_call_operand.hbm [shape: f32[32,64], index: 4, kind: input, shape index: {}]   ;;  %s2396_s5 = inlined_call_operand.vmem [shape: f32[1,64], index: 5, kind: input, shape index: {}]   ;;  %s2397_s6 = inlined_call_operand.hbm [shape: f32[32,32], index: 6, kind: input, shape index: {}]   ;;  %s2398_s7 = inlined_call_operand.vmem [shape: f32[1,32], index: 7, kind: input, shape index: {}]   ;;  %s2399_s8 = inlined_call_operand.hbm [shape: f32[2,8,32], index: 8, kind: output, shape index: {}]  }
   0x1   :  { %2404 = sst [smem:[#allocation19_spill]] %s2391_s0 }
   0x2   :  { %2405 = sst [smem:[#allocation20_spill]] %s2393_s2 }
   0x3   :  { %2406 = sst [smem:[#allocation21_spill]] %s2395_s4 }
   0x4   :  { %2407 = sst [smem:[#allocation22_spill]] %s2397_s6 }
   0x5   :  { %13 = vsyncpa [#allocation3], 0 }
   0x6   :  { %15 = vsyncpa [#allocation3 + $0x1], 0 }
   0x7   :  { %16 = vsyncpa [#allocation6], 0 }
   0x8   :  { %18 = vsyncpa [#allocation6 + $0x1], 0 }
   0x9   :  { %19 = vsyncpa [#allocation9], 0 }
   0xa   :  { %20 = vsyncpa [#allocation4], 0 }
   0xb   :  { %22 = vsyncpa [#allocation4 + $0x1], 0  ;;  %s2087_s27 = smov 0   ;;  %s2089_s28 = smov 0  }
   0xc   :  { %s2091_s29 = smov 0   ;;  %s2093_s30 = smov 0  }
   0xd   :  { %s2095_s9 = smov 0   ;;  %s2097_s10 = smov 0  }
   0xe LB: > { %s2118_s11 = sadd.s32 4294967295, %s2023_s10   ;;  %s1521_s12 = sadd.s32 4294967294, %s2023_s10   ;;  %s2023_s10 = sphi %s2097_s10, %s28_s10   ;;  %s2019_s9 = sphi %s2095_s9, %s2434_s9   ;;  %s2015_s30 = sphi %s2093_s30, %s2433_s30   ;;  %s2011_s29 = sphi %s2091_s29, %s2432_s29   ;;  %s2007_s28 = sphi %s2089_s28, %s2431_s28   ;;  %s2003_s27 = sphi %s2087_s27, %s2430_s27  }
   0xf   : > { %p62_p0 = scmp.ne.s32.totalorder %s2007_s28, %s2003_s27  ;;  %p2400_p1 = scmp.eq.s32.totalorder %s2118_s11, 0 }
  0x10   : > { %p246_p3 = scmp.eq.s32.totalorder %s1521_s12, 1  ;;  %p1522_p5 = scmp.ge.s32.totalorder %s2023_s10, 1 }
  0x11   : > { %p2127_p4 = por %p2400_p1, %p62_p0  ;;  %p253_p7 = scmp.lt.s32.totalorder %s2023_s10, 3 }
  0x12   : > { %p2132_p6 = por %p246_p3, %p62_p0  ;;  %s2025_s16 = smov [#allocation7]  }
  0x13   : > { %s2408_s13 = scalar_select %p2127_p4, 1, 0 }
  0x14   : > { %s2409_s14 = scalar_select %p2132_p6, 1, 0 }
  0x15   : > { %p2137_p8 = pnand %p1522_p5, %p253_p7  ;;  %s265_s17 = sshll.u32 %s2025_s16, 4  ;;  %s266_s17 = int_to_ptr.vmem [resolvable:$true] %s265_s17 }
  0x16   : > { %2410 = sst [smem:[#allocation17_spill]] %s2409_s14  ;;  %s2026_s19 = smov [#allocation8]  }
  0x17   : > { %p1682_p9 = pneg %p2137_p8  ;;  %s281_s20 = sshll.u32 %s2026_s19, 4  ;;  %s282_s20 = int_to_ptr.vmem [resolvable:$true] %s281_s20 }
  0x18   : > { %s2027_s21 = smov [#allocation10]   ;;  %s1808_s23 = scalar_lea.vmem %s266_s17, 512 }
  0x19   : > { %p2146_p11 = pnand %p1682_p9, %p2400_p1  ;;  %s297_s22 = sshll.u32 %s2027_s21, 4  ;;  %s298_s22 = int_to_ptr.vmem [resolvable:$true] %s297_s22 }
  0x1a   : > { %p1809_p13 = scmp.ne.s32.totalorder %s266_s17, %s1808_s23  ;;  %p1816_p5 = scmp.lt.s32.totalorder %s266_s17, %s266_s17 }
  0x1b   : > { %p1799_p12 = pneg %p2146_p11  ;;  %p1817_p7 = scmp.lt.s32.totalorder %s1808_s23, %s1808_s23 }
  0x1d   : > { %p1811_p0 = pnand %p1809_p13, %p1799_p12  ;;  %p1818_p9 = por %p1817_p7, %p1816_p5 }
  0x1f   : > { %p1812_p3 = pneg %p1811_p0 }
  0x21   : > { %p1819_p10 = pnand %p1818_p9, %p1812_p3 }
  0x23   : > { %1822 = shalt.err (!%p1819_p10)
}
  0x24   : > { %s2028_s24 = smov 128   ;;  %s2029_s25 = smov 8  }
  0x25   : > { %s2413_s2 = sld [smem:[#allocation20_spill]]  ;;  %s1834_s16 = scalar_lea.vmem %s282_s20, 512 }
  0x26   : > { %p1835_p1 = scmp.ne.s32.totalorder %s282_s20, %s1834_s16  ;;  %p1842_p2 = scmp.lt.s32.totalorder %s282_s20, %s282_s20 }
  0x27   : > { %p1843_p6 = scmp.lt.s32.totalorder %s1834_s16, %s1834_s16 }
  0x28   : > { %p1837_p13 = pnand %p1835_p1, %p1799_p12 }
  0x29   : > { %p1844_p5 = por %p1843_p6, %p1842_p2 }
  0x2a   : > { %p1838_p0 = pneg %p1837_p13 }
  0x2b   : > { %1685 = dma.hbm_to_vmem [thread:$0]  (!%p2146_p11), %s2413_s2, 512, %s266_s17, [#allocation6], %s2028_s24, %s2028_s24, %s2029_s25  }
  0x2c   : > { %p1845_p3 = pnand %p1844_p5, %p1838_p0 }
  0x2e   : > { %1848 = shalt.err (!%p1845_p3)
}
  0x2f   : > { %s2414_s4 = sld [smem:[#allocation21_spill]]  ;;  %s1860_s17 = scalar_lea.vmem %s298_s22, 512 }
  0x30   : > { %p1861_p10 = scmp.ne.s32.totalorder %s298_s22, %s1860_s17  ;;  %p1868_p9 = scmp.lt.s32.totalorder %s298_s22, %s298_s22 }
  0x31   : > { %p1869_p13 = scmp.lt.s32.totalorder %s1860_s17, %s1860_s17 }
  0x32   : > { %p1863_p7 = pnand %p1861_p10, %p1799_p12 }
  0x33   : > { %p1870_p4 = por %p1869_p13, %p1868_p9 }
  0x34   : > { %p1864_p1 = pneg %p1863_p7 }
  0x35   : > { %1688 = dma.hbm_to_vmem [thread:$0]  (!%p2146_p11), %s2414_s4, 512, %s282_s20, [#allocation9], %s2028_s24, %s2028_s24, %s2029_s25  }
  0x36   : > { %p1871_p2 = pnand %p1870_p4, %p1864_p1 }
  0x38   : > { %1874 = shalt.err (!%p1871_p2)
}
  0x39   : > { %s2415_s6 = sld [smem:[#allocation22_spill]]  ;;  %s49_s20 = sadd.s32 1, %s2011_s29 }
  0x3a   : > { %s40_s12 = sadd.s32 1, %s2019_s9  ;;  %p56_p4 = scmp.ne.s32.totalorder %s2011_s29, %s2007_s28 }
  0x3b   : > { %p42_p6 = scmp.ge.s32.totalorder %s40_s12, 2  ;;  %p57_p12 = scmp.eq.s32.totalorder %s2023_s10, 0 }
  0x3c   : > { %p2416_p0 = scmp.eq.s32.totalorder %s2118_s11, 1  ;;  %p1706_p3 = scmp.lt.s32.totalorder %s2023_s10, 2 }
  0x3d   : > { %s2436_s12 = smov (%p42_p6, %s40_s12), 0  ;;  %p58_p10 = por %p57_p12, %p56_p4 }
  0x3e   : > { %p2183_p5 = por %p2416_p0, %p56_p4  ;;  %2418 = sst [smem:[#allocation18_spill]] %s2436_s12 }
  0x3f   : > { %1691 = dma.hbm_to_vmem [thread:$0]  (!%p2146_p11), %s2415_s6, 512, %s298_s22, [#allocation9], %s2028_s24, %s2028_s24, %s2029_s25  }
  0x40   : > { %s314_s16 = sand.u32 1, %s2011_s29   ;;  %s44_s19 = ssub.s32 %s2019_s9, %s2436_s12 }
  0x41   : > { %p47_p11 = scmp.eq.s32.totalorder %s44_s19, 0  ;;  %s1527_s22 = sshll.u32 %s314_s16, 3 }
  0x42   : > { %s1528_s24 = sshll.u32 %s2019_s9, 7  ;;  %s2419_s0 = sld [smem:[#allocation19_spill]] }
  0x43   : > { %s2195_s25 = scalar_select %p47_p11, %s2011_s29, %s49_s20  }
  0x44   : > { %s318_s26 = scalar_lea.vmem [#allocation2], %s1527_s22  ;;  %p2202_p7 = pnand %p1706_p3, %p58_p10 }
  0x45   : > { %s326_s2 = sshll.u32 %s318_s26, 4  ;;  %s2209_s19 = scalar_lea.hbm %s2392_s1, %s1528_s24  ;;  %s327_s2 = int_to_ptr.vmem [resolvable:$true] %s326_s2 }
  0x46   : > { %s333_s20 = sand.u32 1, %s2023_s10   ;;  %s315_s12 = scalar_lea.sflag [#allocation3], %s314_s16 }
  0x47   : > { %p1877_p1 = pneg %p2202_p7  ;;  %s1888_s21 = scalar_lea.vmem %s327_s2, 128 }
  0x48   : > { %s324_s23 = scalar_lea.hbm %s2419_s0, %s1528_s24  ;;  %p1889_p9 = scmp.ne.s32.totalorder %s327_s2, %s1888_s21 }
  0x49   : > { %s2030_s17 = smov [#allocation2]  }
  0x4a   : > { %p1891_p13 = pnand %p1889_p9, %p1877_p1  ;;  %s1893_s26 = sshll.u32 %s2030_s17, 4  ;;  %s1894_s26 = int_to_ptr.vmem [resolvable:$false] %s1893_s26 }
  0x4b   : > { %s1895_s0 = scalar_lea.vmem %s1894_s26, 256  ;;  %p1896_p4 = scmp.lt.s32.totalorder %s327_s2, %s1894_s26 }
  0x4c   : > { %p1892_p2 = pneg %p1891_p13  ;;  %p1897_p6 = scmp.lt.s32.totalorder %s1895_s0, %s1888_s21 }
  0x4e   : > { %p1898_p12 = por %p1897_p6, %p1896_p4 }
  0x50   : > { %p1899_p0 = pnand %p1898_p12, %p1892_p2 }
  0x52   : > { %1902 = shalt.err (!%p1899_p0)
}
  0x53   : > { %1695 = dma.hbm_to_vmem [thread:$0]  (!%p2202_p7), %s324_s23, 128, %s327_s2, %s315_s12  }
  0x54   : > { %s337_s6 = scalar_lea.vmem [#allocation5], %s1527_s22  ;;  %s334_s16 = scalar_lea.sflag [#allocation6], %s333_s20 }
  0x55   : > { %s344_s14 = sshll.u32 %s337_s6, 4  ;;  %s2031_s17 = smov [#allocation5]   ;;  %s345_s14 = int_to_ptr.vmem [resolvable:$true] %s344_s14 }
  0x56   : > { %s1916_s24 = scalar_lea.vmem %s345_s14, 128  ;;  %s1921_s26 = sshll.u32 %s2031_s17, 4  ;;  %s1922_s26 = int_to_ptr.vmem [resolvable:$false] %s1921_s26 }
  0x57   : > { %p1917_p3 = scmp.ne.s32.totalorder %s345_s14, %s1916_s24  ;;  %s1923_s0 = scalar_lea.vmem %s1922_s26, 256 }
  0x58   : > { %p1924_p9 = scmp.lt.s32.totalorder %s345_s14, %s1922_s26  ;;  %p1925_p13 = scmp.lt.s32.totalorder %s1923_s0, %s1916_s24 }
  0x59   : > { %p1919_p10 = pnand %p1917_p3, %p1877_p1 }
  0x5a   : > { %p1926_p2 = por %p1925_p13, %p1924_p9 }
  0x5b   : > { %p1920_p11 = pneg %p1919_p10 }
  0x5d   : > { %p1927_p4 = pnand %p1926_p2, %p1920_p11 }
  0x5f   : > { %1930 = shalt.err (!%p1927_p4)
}
  0x60   : > { %1698 = dma.hbm_to_vmem [thread:$0]  (!%p2202_p7), %s2209_s19, 128, %s345_s14, %s334_s16  }
  0x61   : > { %353 = sbr.rel (%p2137_p8) target bundleno = 1317 (0x525), region = 52  ;;  %s2228_s2 = sand.u32 (!%p2137_p8), 1, %s2007_s28  }
  0x62   : > { %s2231_s12 = sshll.u32 (!%p2137_p8), %s2228_s2, 3  ;;  %s356_s22 = scalar_lea.sflag (!%p2137_p8), [#allocation3], %s2228_s2 }
  0x63   : > { %s359_s23 = scalar_lea.vmem (!%p2137_p8), [#allocation2], %s2231_s12  ;;  %p2421_p1 = scmp.ne.s32.totalorder (!%p2137_p8), %s2408_s13, 0 }
  0x66   : > { %1982 = dma.done.wait (%p2421_p1), %s356_s22, 128  }
  0x67   : > { %1984 = vsyncadd (%p2421_p1), %s356_s22, 4294967168  ;;  %s364_s4 = sand.u32 1, %s2118_s11   ;;  %s368_s19 = scalar_lea.vmem [#allocation5], %s2231_s12 }
  0x68   : > { %s365_s15 = scalar_lea.sflag [#allocation6], %s364_s4 }
  0x69   : > { %1986 = dma.done.wait (%p2421_p1), %s365_s15, 128  }
  0x6a   : > { %1988 = vsyncadd (%p2421_p1), %s365_s15, 4294967168  ;;  %p2422_p8 = scmp.eq.s32.totalorder %s2118_s11, 0 }
  0x6c   : > { %1990 = dma.done.wait (%p2422_p8), [#allocation6], 512   ;;  %p2423_p7 = pmov %p2422_p8 }
  0x6e   : > { %1992 = vsyncadd (%p2423_p7), [#allocation6], 4294966784  ;;  %p2424_p6 = pmov %p2423_p7 }
  0x70   : > { %1994 = dma.done.wait (%p2424_p6), [#allocation9], 1024   ;;  %p2425_p12 = pmov %p2424_p6 }
  0x71   : > { %v2032_v0 = vmov 0.0   ;;  %vm2033_vm0 = vmmov 0   ;;  %v515_v1 = vld [vmem:[#allocation8 + $0x18] sm:$0xff]  ;;  %v514_v3 = vld [vmem:[#allocation8 + $0x10] sm:$0xff]  ;;  %v513_v5 = vld [vmem:[#allocation8 + $0x8] sm:$0xff]  ;;  %vm430_vm1 = vcmask 261120  }
  0x72   : > { %1996 = vsyncadd (%p2425_p12), [#allocation9], 4294966272  ;;  %1602 = vmatprep.subr.mxu1 %v2032_v0  ;;  %1591 = vmatprep.subr.mxu0 %v2032_v0  ;;  %v422_v2 = vld [vmem:[#allocation7 + $0x18] sm:$0xff]  ;;  %v421_v4 = vld [vmem:[#allocation7 + $0x10] sm:$0xff]  ;;  %vm603_vm2 = vcmask 64512   ;;  %s2034_s6 = smov 112  }
  0x73   : > { %1610 = vmatprep.mubr.msk.f32.mxu1 %vm2033_vm0, %v2032_v0  ;;  %1599 = vmatprep.mubr.msk.f32.mxu0 %vm2033_vm0, %v2032_v0  ;;  %v420_v6 = vld [vmem:[#allocation7 + $0x8] sm:$0xff]  ;;  %v512_v7 = vld [vmem:[#allocation8] sm:$0xff]  ;;  %v511_v9 = vld [vmem:[%s368_s19] sm:$0xff]  ;;  %s2035_s14 = smov 120   ;;  %s2036_s16 = smov 104   ;;  %vm1285_vm3 = vcmask 130048  }
  0x74   : > { %1603 = vmatpush3.msra.mxu1 %v515_v1  ;;  %1592 = vmatpush3.msra.mxu0 %v422_v2  ;;  %v419_v8 = vld [vmem:[#allocation7] sm:$0xff]  ;;  %s2037_s24 = smov 96   ;;  %s2038_s17 = smov 8   ;;  %vm1287_vm4 = vcmask 195584  }
  0x75   : > { %1604 = vmatprep.subr.mxu1 %v2032_v0  ;;  %1593 = vmatprep.subr.mxu0 %v2032_v0  ;;  %v418_v10 = vld [vmem:[%s359_s23] sm:$0xff]  ;;  %s2039_s26 = smov 16   ;;  %s2040_s0 = smov 24  }
  0x76   : > { %1605 = vmatpush3.msra.mxu1 %v514_v3  ;;  %1594 = vmatpush3.msra.mxu0 %v421_v4  ;;  %v1540_v11 = vld [vmem:[%s2396_s5] ss:$0 sm:$0xff]  ;;  %s1557_s4 = sshll.u32 %s2015_s30, 7  ;;  %s417_s15 = scalar_lea.vmem [#allocation11], %s2231_s12 }
  0x77   : > { %1606 = vmatprep.subr.mxu1 %v2032_v0  ;;  %1595 = vmatprep.subr.mxu0 %v2032_v0  ;;  %v1538_v13 = vld [vmem:[%s2394_s3] ss:$0 sm:$0xff]  ;;  %s1389_s19 = sshll.u32 %s417_s15, 4  ;;  %s2348_s20 = scalar_lea.hbm %s2399_s8, %s1557_s4  ;;  %s1390_s19 = int_to_ptr.vmem [resolvable:$true] %s1389_s19 }
  0x78   : > { %1607 = vmatpush3.msra.mxu1 %v513_v5  ;;  %1596 = vmatpush3.msra.mxu0 %v420_v6  ;;  %s1375_s21 = scalar_lea.sflag [#allocation4], %s2228_s2  ;;  %s2041_s30 = smov [#allocation11]  }
  0x79   : > { %1608 = vmatprep.subr.mxu1 %v2032_v0  ;;  %1597 = vmatprep.subr.mxu0 %v2032_v0  ;;  %s1935_s12 = sshll.u32 %s2041_s30, 4  ;;  %s1936_s12 = int_to_ptr.vmem [resolvable:$false] %s1935_s12 }
  0x7a   : > { %1609 = vmatpush3.msra.mxu1 %v512_v7  ;;  %1598 = vmatpush3.msra.mxu0 %v419_v8  ;;  %p1938_p11 = scmp.lt.s32.totalorder %s1390_s19, %s1936_s12 }
  0x7b   : > { %1611 = vmatmul.mubr.msk.f32.vlgmr.msra.gmra.mxu1 %vm430_vm1, %v511_v9  ;;  %1600 = vmatmul.mubr.msk.f32.vlgmr.msra.gmra.mxu0 %vm430_vm1, %v418_v10 }
  0x7c   : > { %1613 = vmatprep.subr.mxu1 %v2032_v0  ;;  %1615 = vmatprep.mubr.msk.f32.mxu1 %vm2033_vm0, %v2032_v0 }
  0x7d   : > { %1623 = vmatprep.subr.mxu0 %v2032_v0  ;;  %1625 = vmatprep.mubr.msk.f32.mxu0 %vm2033_vm0, %v2032_v0 }
 0x13b   : > { %v592_v12 = vpop.f32.mrf.mxu1  ;;  %v500_v14 = vpop.f32.mrf.mxu0 }
 0x13c   : > { %v593_v15 = vadd.f32 %v1540_v11, %v592_v12  ;;  %v501_v18 = vadd.f32 %v1538_v13, %v500_v14 }
 0x13d   : > { %v1612_v16 = vpop.f32.mrf.mxu1  ;;  %v1601_v17 = vpop.f32.mrf.mxu0 }
 0x13e   : > { %599 = vrot.lane.b32.xlu1 %v593_v15, %s2034_s6  ;;  %597 = vrot.lane.b32.xlu0 %v593_v15, %s2035_s14  ;;  %v1292_v17 = vld [vmem:[#allocation10 + $0x18] sm:$0xff] }
 0x13f   : > { %1614 = vmatpush3.xpose.msk.msra.mxu1 %vm603_vm2, %v593_v15 }
 0x140   : > { %1618 = vmatprep.subr.mxu1 %v2032_v0 }
 0x142   : > { %1616 = vmatmul.mubr.msk.f32.vlgmr.msra.gmra.mxu1 %vm603_vm2, %v501_v18  ;;  %601 = vrot.lane.b32.xlu1 %v593_v15, %s2036_s16 }
 0x143   : > { %505 = vrot.lane.b32.xlu0 %v501_v18, %s2035_s14  ;;  %1620 = vmatprep.mubr.msk.f32.mxu1 %vm2033_vm0, %v2032_v0  ;;  %s1937_s14 = scalar_lea.vmem %s1936_s12, 256 }
 0x146   : > { %509 = vrot.lane.b32.xlu1 %v501_v18, %s2036_s16 }
 0x147   : > { %507 = vrot.lane.b32.xlu0 %v501_v18, %s2034_s6  ;;  %s1931_s6 = scalar_lea.vmem %s1390_s19, 128 }
 0x148   : > { %p1932_p0 = scmp.ne.s32.totalorder %s1390_s19, %s1931_s6  ;;  %p1939_p9 = scmp.lt.s32.totalorder %s1937_s14, %s1931_s6 }
 0x14a   : > { %956 = vrot.lane.b32.xlu1 %v593_v15, %s2037_s24  ;;  %p1933_p3 = pnand %p1932_p0, %p2183_p5  ;;  %p1940_p13 = por %p1939_p9, %p1938_p11 }
 0x14c   : > { %p1934_p10 = pneg %p1933_p3 }
 0x14e   : > { %p1941_p2 = pnand %p1940_p13, %p1934_p10 }
 0x1b0   : > { %v600_v19 = vpop.permute.xlu1 %599  ;;  %v598_v20 = vpop.permute.xlu0 %597 }
 0x1b1   : > { %1619 = vmatpush3.xpose.msk.msra.mxu1 %vm603_vm2, %v598_v20  ;;  %1624 = vmatpush3.xpose.msk.msra.mxu0 %vm603_vm2, %v600_v19 }
 0x1b2   : > { %1628 = vmatprep.subr.mxu1 %v2032_v0  ;;  %1633 = vmatprep.subr.mxu0 %v2032_v0 }
 0x1b4   : > { %v602_v21 = vpop.permute.xlu1 %601 }
 0x1b5   : > { %v506_v22 = vpop.permute.xlu0 %505 }
 0x1b6   : > { %1621 = vmatmul.mubr.msk.f32.vlgmr.msra.gmra.mxu1 %vm603_vm2, %v506_v22  ;;  %v1289_v22 = vld [vmem:[#allocation10] sm:$0xff] }
 0x1b7   : > { %1629 = vmatpush3.xpose.msk.msra.mxu1 %vm603_vm2, %v602_v21  ;;  %1630 = vmatprep.mubr.msk.f32.mxu1 %vm2033_vm0, %v2032_v0 }
 0x1b8   : > { %v510_v23 = vpop.permute.xlu1 %509  ;;  %1638 = vmatprep.subr.mxu1 %v2032_v0 }
 0x1b9   : > { %v508_v24 = vpop.permute.xlu0 %507 }
 0x1ba   : > { %1626 = vmatmul.mubr.msk.f32.vlgmr.msra.gmra.mxu0 %vm603_vm2, %v508_v24  ;;  %1631 = vmatmul.mubr.msk.f32.vlgmr.msra.gmra.mxu1 %vm603_vm2, %v510_v23 }
 0x1bb   : > { %1635 = vmatprep.mubr.msk.f32.mxu0 %vm2033_vm0, %v2032_v0  ;;  %1640 = vmatprep.mubr.msk.f32.mxu1 %vm2033_vm0, %v2032_v0 }
 0x1bc   : > { %v957_v25 = vpop.permute.xlu1 %956 }
 0x1bd   : > { %1634 = vmatpush3.msra.mxu0 %v957_v25 }
 0x1be   : > { %1643 = vmatprep.subr.mxu0 %v2032_v0 }
 0x202   : > { %v674_v26 = vpop.f32.mrf.mxu1 }
 0x203   : > { %v900_v27 = vsel %vm603_vm2, %v674_v26, -inf }
 0x204   : > { %901 = vmax.xlane.f32.xlu0 %v900_v27  ;;  %v1617_v28 = vpop.f32.mrf.mxu1 }
 0x276   : > { %v748_v29 = vpop.f32.mrf.mxu1 }
 0x277   : > { %v903_v30 = vsel %vm603_vm2, %v748_v29, -inf }
 0x278   : > { %904 = vmax.xlane.f32.xlu1 %v903_v30  ;;  %v1622_v31 = vpop.f32.mrf.mxu1 }
 0x27a   : > { %v822_v32 = vpop.f32.mrf.mxu0  ;;  %v896_v33 = vpop.f32.mrf.mxu1 }
 0x27b   : > { %v906_v34 = vsel %vm603_vm2, %v822_v32, -inf  ;;  %v909_v37 = vsel %vm603_vm2, %v896_v33, -inf }
 0x27c   : > { %v1632_v35 = vpop.f32.mrf.mxu1  ;;  %907 = vmax.xlane.f32.xlu0 %v906_v34  ;;  %v1627_v36 = vpop.f32.mrf.mxu0 }
 0x280   : > { %910 = vmax.xlane.f32.xlu0 %v909_v37 }
 0x289   : > { %1108 = vrot.lane.b32.xlu1 %v600_v19, %s2037_s24  ;;  %v1291_v19 = vld [vmem:[#allocation10 + $0x10] sm:$0xff] }
 0x28d   : > { %v2310_v38 = vpop.xlane.xlu0 %901  ;;  %1184 = vrot.lane.b32.xlu1 %v602_v21, %s2037_s24 }
 0x28e   : > { %v924_v39 = vsub.f32 %v674_v26, %v2310_v38  ;;  %v912_v36 = vsub.f32 -inf, %v2310_v38 }
 0x290   : > { %v928_v40 = vmul.f32 1.442695, %v924_v39  ;;  %v916_v37 = vmul.f32 1.442695, %v912_v36 }
 0x292   : > { %1773 = vpow2.f32 %v928_v40 }
 0x296   : > { %1032 = vrot.lane.b32.xlu0 %v598_v20, %s2037_s24  ;;  %v1290_v20 = vld [vmem:[#allocation10 + $0x8] sm:$0xff] }
 0x29f   : > { %v1774_v41 = vpop.eup %1773 }
 0x2a0   : > { %1636 = vmatmul.mubr.msk.f32.vlgmr.msra.gmra.mxu0 %vm603_vm2, %v1774_v41  ;;  %v940_v60 = vsel %vm603_vm2, %v1774_v41, 0.0 }
 0x2a1   : > { %1645 = vmatprep.mubr.msk.f32.mxu0 %vm2033_vm0, %v2032_v0 }
 0x301   : > { %v905_v42 = vpop.xlane.xlu1 %904 }
 0x302   : > { %v925_v43 = vsub.f32 %v748_v29, %v905_v42  ;;  %v913_v63 = vsub.f32 -inf, %v905_v42 }
 0x304   : > { %v930_v44 = vmul.f32 1.442695, %v925_v43  ;;  %v918_v1 = vmul.f32 1.442695, %v913_v63 }
 0x305   : > { %v1109_v45 = vpop.permute.xlu1 %1108  ;;  %v908_v46 = vpop.xlane.xlu0 %907 }
 0x306   : > { %v926_v47 = vsub.f32 %v822_v32, %v908_v46  ;;  %1644 = vmatpush3.msra.mxu0 %v1109_v45  ;;  %1775 = vpow2.f32 %v930_v44  ;;  %v914_v2 = vsub.f32 -inf, %v908_v46 }
 0x307   : > { %1653 = vmatprep.subr.mxu0 %v2032_v0 }
 0x308   : > { %v932_v48 = vmul.f32 1.442695, %v926_v47  ;;  %v920_v3 = vmul.f32 1.442695, %v914_v2 }
 0x309   : > { %v911_v49 = vpop.xlane.xlu0 %910  ;;  %v1185_v54 = vpop.permute.xlu1 %1184 }
 0x30a   : > { %v927_v50 = vsub.f32 %v896_v33, %v911_v49  ;;  %1777 = vpow2.f32 %v932_v48  ;;  %v915_v4 = vsub.f32 -inf, %v911_v49 }
 0x30c   : > { %v934_v51 = vmul.f32 1.442695, %v927_v50  ;;  %v922_v5 = vmul.f32 1.442695, %v915_v4 }
 0x30d   : > { %v1033_v52 = vpop.permute.xlu0 %1032 }
 0x30e   : > { %1639 = vmatpush3.msra.mxu1 %v1033_v52  ;;  %1779 = vpow2.f32 %v934_v51  ;;  %v1554_v51 = vld [vmem:[%s2398_s7] ss:$0 sm:$0xff] }
 0x30f   : > { %1648 = vmatprep.subr.mxu1 %v2032_v0  ;;  %1781 = vpow2.f32 %v918_v1 }
 0x310   : > { %1783 = vpow2.f32 %v920_v3 }
 0x311   : > { %1785 = vpow2.f32 %v922_v5 }
 0x313   : > { %v1776_v53 = vpop.eup %1775 }
 0x314   : > { %1641 = vmatmul.mubr.msk.f32.vlgmr.msra.gmra.mxu1 %vm603_vm2, %v1776_v53  ;;  %v943_v55 = vsel %vm603_vm2, %v1776_v53, 0.0 }
 0x315   : > { %1649 = vmatpush3.msra.mxu1 %v1185_v54  ;;  %944 = vadd.xlane.f32.xlu0 %v943_v55 }
 0x316   : > { %1650 = vmatprep.mubr.msk.f32.mxu1 %vm2033_vm0, %v2032_v0 }
 0x317   : > { %v1778_v56 = vpop.eup %1777 }
 0x318   : > { %1646 = vmatmul.mubr.msk.f32.vlgmr.msra.gmra.mxu0 %vm603_vm2, %v1778_v56  ;;  %v946_v57 = vsel %vm603_vm2, %v1778_v56, 0.0 }
 0x319   : > { %947 = vadd.xlane.f32.xlu1 %v946_v57  ;;  %1661 = vmatprep.mubr.msk.f32.mxu0 %vm2033_vm0, %v2032_v0 }
 0x31a   : > { %1654 = vmatpush3.msra.mxu0 %v1292_v17 }
 0x31b   : > { %v1780_v58 = vpop.eup %1779  ;;  %1655 = vmatprep.subr.mxu0 %v2032_v0 }
 0x31c   : > { %1651 = vmatmul.mubr.msk.f32.vlgmr.msra.gmra.mxu1 %vm603_vm2, %v1780_v58  ;;  %v949_v59 = vsel %vm603_vm2, %v1780_v58, 0.0  ;;  %v1782_v6 = vpop.eup %1781  ;;  %1656 = vmatpush3.msra.mxu0 %v1291_v19 }
 0x31d   : > { %950 = vadd.xlane.f32.xlu0 %v949_v59  ;;  %v937_v8 = vmul.f32 0.0, %v1782_v6  ;;  %v1784_v9 = vpop.eup %1783  ;;  %1657 = vmatprep.subr.mxu0 %v2032_v0 }
 0x31e   : > { %v938_v12 = vmul.f32 0.0, %v1784_v9  ;;  %v1786_v13 = vpop.eup %1785  ;;  %1658 = vmatpush3.msra.mxu0 %v1290_v20 }
 0x31f   : > { %v939_v16 = vmul.f32 0.0, %v1786_v13  ;;  %1659 = vmatprep.subr.mxu0 %v2032_v0 }
 0x320   : > { %1660 = vmatpush3.msra.mxu0 %v1289_v22 }
 0x321   : > { %941 = vadd.xlane.f32.xlu0 %v940_v60 }
 0x360   : > { %v2331_v61 = vpop.f32.mrf.mxu0 }
 0x362   : > { %v1637_v62 = vpop.f32.mrf.mxu0 }
 0x39e   : > { %v945_v7 = vpop.xlane.xlu0 %944 }
 0x39f   : > { %v953_v10 = vadd.f32 %v945_v7, %v937_v8 }
 0x3a1   : > { %1787 = vrcp.f32 %v953_v10 }
 0x3a2   : > { %v948_v11 = vpop.xlane.xlu1 %947 }
 0x3a3   : > { %v954_v14 = vadd.f32 %v948_v11, %v938_v12 }
 0x3a5   : > { %1789 = vrcp.f32 %v954_v14 }
 0x3a6   : > { %v951_v15 = vpop.xlane.xlu0 %950 }
 0x3a7   : > { %v955_v18 = vadd.f32 %v951_v15, %v939_v16 }
 0x3a9   : > { %1791 = vrcp.f32 %v955_v18 }
 0x3aa   : > { %1793 = vpow2.f32 %v916_v37  ;;  %v942_v40 = vpop.xlane.xlu0 %941 }
 0x3ae   : > { %v1788_v24 = vpop.eup %1787 }
 0x3b2   : > { %v1790_v29 = vpop.eup %1789 }
 0x3b6   : > { %v1792_v34 = vpop.eup %1791 }
 0x3b7   : > { %v1794_v39 = vpop.eup %1793 }
 0x3b8   : > { %v936_v41 = vmul.f32 0.0, %v1794_v39 }
 0x3ba   : > { %v952_v42 = vadd.f32 %v942_v40, %v936_v41  ;;  %v1260_v44 = vadd.f32 %v2331_v61, %v936_v41 }
 0x3bc   : > { %1795 = vrcp.f32 %v952_v42 }
 0x3c9   : > { %v1796_v43 = vpop.eup %1795 }
 0x3ca   : > { %v1268_v46 = vmul.f32 %v1796_v43, %v1260_v44 }
 0x3d4   : > { %v1104_v21 = vpop.f32.mrf.mxu1 }
 0x3d5   : > { %v1261_v23 = vadd.f32 %v1104_v21, %v937_v8 }
 0x3d6   : > { %v1642_v25 = vpop.f32.mrf.mxu1 }
 0x3d7   : > { %v1269_v26 = vmul.f32 %v1788_v24, %v1261_v23 }
 0x3d8   : > { %v1180_v27 = vpop.f32.mrf.mxu0 }
 0x3d9   : > { %v1262_v28 = vadd.f32 %v1180_v27, %v938_v12  ;;  %1273 = vrot.lane.b32.xlu1 %v1269_v26, %s2038_s17 }
 0x3da   : > { %v1647_v30 = vpop.f32.mrf.mxu0 }
 0x3db   : > { %v1270_v31 = vmul.f32 %v1790_v29, %v1262_v28 }
 0x3dc   : > { %v1256_v32 = vpop.f32.mrf.mxu1 }
 0x3dd   : > { %v1263_v33 = vadd.f32 %v1256_v32, %v939_v16  ;;  %1277 = vrot.lane.b32.xlu0 %v1270_v31, %s2039_s26 }
 0x3de   : > { %v1652_v35 = vpop.f32.mrf.mxu1 }
 0x3df   : > { %v1271_v0 = vmul.f32 %v1792_v34, %v1263_v33 }
 0x3e1   : > { %1281 = vrot.lane.b32.xlu1 %v1271_v0, %s2040_s0 }
 0x44b   : > { %v1274_v45 = vpop.permute.xlu1 %1273 }
 0x44c   : > { %v1284_v38 = vsel %vm603_vm2, %v1268_v46, %v1274_v45 }
 0x44f   : > { %v1278_v47 = vpop.permute.xlu0 %1277 }
 0x450   : > { %v1286_v48 = vsel %vm1285_vm3, %v1284_v38, %v1278_v47 }
 0x453   : > { %v1282_v49 = vpop.permute.xlu1 %1281 }
 0x454   : > { %v1288_v50 = vsel %vm1287_vm4, %v1286_v48, %v1282_v49 }
 0x455   : > { %1662 = vmatmul.mubr.msk.f32.vlgmr.msra.gmra.mxu0 %vm430_vm1, %v1288_v50 }
 0x515   : > { %v1369_v52 = vpop.f32.mrf.mxu0 }
 0x516   : > { %v1370_v53 = vadd.f32 %v1554_v51, %v1369_v52 }
 0x517   : > { %v1663_v54 = vpop.f32.mrf.mxu0 }
 0x518   : > { %1373 = vst.msk [vmem:[%s417_s15] sm:$0xff] %vm430_vm1, %v1370_v53 }
 0x519   : > { %1944 = shalt.err (!%p1941_p2)
}
 0x51a   : > { %s1945_s16 = scalar_lea.hbm %s2348_s20, 128  ;;  %s1949_s17 = scalar_lea.hbm %s2399_s8, 256 }
 0x51b   : > { %p1946_p4 = scmp.ne.s32.totalorder %s2348_s20, %s1945_s16  ;;  %p1950_p7 = scmp.lt.s32.totalorder %s2348_s20, %s2399_s8 }
 0x51c   : > { %p1951_p6 = scmp.lt.s32.totalorder %s1949_s17, %s1945_s16 }
 0x51d   : > { %p1947_p1 = pnand %p1946_p4, %p2183_p5 }
 0x51e   : > { %p1952_p12 = por %p1951_p6, %p1950_p7 }
 0x51f   : > { %p1948_p8 = pneg %p1947_p1 }
 0x521   : > { %p1953_p0 = pnand %p1952_p12, %p1948_p8 }
 0x523   : > { %1956 = shalt.err (!%p1953_p0)
}
 0x524   : > { %1680 = dma.vmem_to_hbm [thread:$0]  (%p2183_p5), %s1390_s19, 128, %s2348_s20, %s1375_s21  }
 0x525 PF: > { %s2426_s22 = sld [smem:[#allocation17_spill]]  ;;  %s1401_s23 = sand.u32 1, %s2003_s27  }
 0x526   : > { %p2428_p10 = scmp.ge.s32.totalorder %s2023_s10, 2  ;;  %s1402_s4 = scalar_lea.sflag [#allocation4], %s1401_s23 }
 0x52b   : > { %p2427_p3 = scmp.ne.s32.totalorder %s2426_s22, 0 }
 0x52d   : > { %p1700_p11 = pnand %p2428_p10, %p2427_p3 }
 0x52f   : > { %p1701_p9 = pneg %p1700_p11 }
 0x531   : > { %1998 = dma.done.wait (%p1701_p9), %s1402_s4, 128  }
 0x532   : > { %2000 = vsyncadd (%p1701_p9), %s1402_s4, 4294967168  ;;  %s28_s10 = sadd.s32 1, %s2023_s10   ;;  %s2429_s18 = sld [smem:[#allocation18_spill]] }
 0x533   : > { %p25_p13 = scmp.ge.s32.totalorder %s28_s10, 4   ;;  %s2430_s27 = smov %s2007_s28 }
 0x534   : > { %s2431_s28 = smov %s2011_s29  ;;  %s2432_s29 = smov %s2195_s25 }
 0x535   : > { %s2433_s30 = smov %s2019_s9  ;;  %27 = sbr.rel (!%p25_p13) target bundleno = 14 (0xe), region = 122 }
 0x538   : > { %s2434_s9 = smov %s2429_s18 }
 0x53a   :  { %1407 = vsyncpa [#allocation3], 1 }
 0x53b   :  { %1409 = vsyncpa [#allocation3 + $0x1], 1 }
 0x53c   :  { %1410 = vsyncpa [#allocation6], 1 }
 0x53d   :  { %1412 = vsyncpa [#allocation6 + $0x1], 1 }
 0x53e   :  { %1413 = vsyncpa [#allocation9], 1 }
 0x53f   :  { %1414 = vsyncpa [#allocation4], 1 }
 0x540   :  { %1416 = vsyncpa [#allocation4 + $0x1], 1 }

// kernel: tpu_custom_call.1
= control target key start
LH: loop header
LB: loop body
LE: loop exit
PB: predicated region body
PF: predicated region fallthrough
CT: control target
= control target key end

     0   :  { %s2391_s0 = inlined_call_operand.hbm [shape: f32[2,8,32], index: 0, kind: input, shape index: {}]   ;;  %s2392_s1 = inlined_call_operand.hbm [shape: f32[2,8,32], index: 1, kind: input, shape index: {}]   ;;  %s2393_s2 = inlined_call_operand.hbm [shape: f32[32,32], index: 2, kind: input, shape index: {}]   ;;  %s2394_s3 = inlined_call_operand.vmem [shape: f32[1,32], index: 3, kind: input, shape index: {}]   ;;  %s2395_s4 = inlined_call_operand.hbm [shape: f32[32,64], index: 4, kind: input, shape index: {}]   ;;  %s2396_s5 = inlined_call_operand.vmem [shape: f32[1,64], index: 5, kind: input, shape index: {}]   ;;  %s2397_s6 = inlined_call_operand.hbm [shape: f32[32,32], index: 6, kind: input, shape index: {}]   ;;  %s2398_s7 = inlined_call_operand.vmem [shape: f32[1,32], index: 7, kind: input, shape index: {}]   ;;  %s2399_s8 = inlined_call_operand.hbm [shape: f32[2,8,32], index: 8, kind: output, shape index: {}]  }
   0x1   :  { %2404 = sst [smem:[#allocation19_spill]] %s2391_s0 }
   0x2   :  { %2405 = sst [smem:[#allocation20_spill]] %s2393_s2 }
   0x3   :  { %2406 = sst [smem:[#allocation21_spill]] %s2395_s4 }
   0x4   :  { %2407 = sst [smem:[#allocation22_spill]] %s2397_s6 }
   0x5   :  { %13 = vsyncpa [#allocation3], 0 }
   0x6   :  { %15 = vsyncpa [#allocation3 + $0x1], 0 }
   0x7   :  { %16 = vsyncpa [#allocation6], 0 }
   0x8   :  { %18 = vsyncpa [#allocation6 + $0x1], 0 }
   0x9   :  { %19 = vsyncpa [#allocation9], 0 }
   0xa   :  { %20 = vsyncpa [#allocation4], 0 }
   0xb   :  { %22 = vsyncpa [#allocation4 + $0x1], 0  ;;  %s2087_s27 = smov 0   ;;  %s2089_s28 = smov 0  }
   0xc   :  { %s2091_s29 = smov 0   ;;  %s2093_s30 = smov 0  }
   0xd   :  { %s2095_s9 = smov 0   ;;  %s2097_s10 = smov 0  }
   0xe LB: > { %s2118_s11 = sadd.s32 4294967295, %s2023_s10   ;;  %s1521_s12 = sadd.s32 4294967294, %s2023_s10   ;;  %s2023_s10 = sphi %s2097_s10, %s28_s10   ;;  %s2019_s9 = sphi %s2095_s9, %s2434_s9   ;;  %s2015_s30 = sphi %s2093_s30, %s2433_s30   ;;  %s2011_s29 = sphi %s2091_s29, %s2432_s29   ;;  %s2007_s28 = sphi %s2089_s28, %s2431_s28   ;;  %s2003_s27 = sphi %s2087_s27, %s2430_s27  }
   0xf   : > { %p62_p0 = scmp.ne.s32.totalorder %s2007_s28, %s2003_s27  ;;  %p2400_p1 = scmp.eq.s32.totalorder %s2118_s11, 0 }
  0x10   : > { %p246_p3 = scmp.eq.s32.totalorder %s1521_s12, 1  ;;  %p1522_p5 = scmp.ge.s32.totalorder %s2023_s10, 1 }
  0x11   : > { %p2127_p4 = por %p2400_p1, %p62_p0  ;;  %p253_p7 = scmp.lt.s32.totalorder %s2023_s10, 3 }
  0x12   : > { %p2132_p6 = por %p246_p3, %p62_p0  ;;  %s2025_s16 = smov [#allocation7]  }
  0x13   : > { %s2408_s13 = scalar_select %p2127_p4, 1, 0 }
  0x14   : > { %s2409_s14 = scalar_select %p2132_p6, 1, 0 }
  0x15   : > { %p2137_p8 = pnand %p1522_p5, %p253_p7  ;;  %s265_s17 = sshll.u32 %s2025_s16, 4  ;;  %s266_s17 = int_to_ptr.vmem [resolvable:$true] %s265_s17 }
  0x16   : > { %2410 = sst [smem:[#allocation17_spill]] %s2409_s14  ;;  %s2026_s19 = smov [#allocation8]  }
  0x17   : > { %p1682_p9 = pneg %p2137_p8  ;;  %s281_s20 = sshll.u32 %s2026_s19, 4  ;;  %s282_s20 = int_to_ptr.vmem [resolvable:$true] %s281_s20 }
  0x18   : > { %s2027_s21 = smov [#allocation10]   ;;  %s1808_s23 = scalar_lea.vmem %s266_s17, 512 }
  0x19   : > { %p2146_p11 = pnand %p1682_p9, %p2400_p1  ;;  %s297_s22 = sshll.u32 %s2027_s21, 4  ;;  %s298_s22 = int_to_ptr.vmem [resolvable:$true] %s297_s22 }
  0x1a   : > { %p1809_p13 = scmp.ne.s32.totalorder %s266_s17, %s1808_s23  ;;  %p1816_p5 = scmp.lt.s32.totalorder %s266_s17, %s266_s17 }
  0x1b   : > { %p1799_p12 = pneg %p2146_p11  ;;  %p1817_p7 = scmp.lt.s32.totalorder %s1808_s23, %s1808_s23 }
  0x1d   : > { %p1811_p0 = pnand %p1809_p13, %p1799_p12  ;;  %p1818_p9 = por %p1817_p7, %p1816_p5 }
  0x1f   : > { %p1812_p3 = pneg %p1811_p0 }
  0x21   : > { %p1819_p10 = pnand %p1818_p9, %p1812_p3 }
  0x23   : > { %1822 = shalt.err (!%p1819_p10)
}
  0x24   : > { %s2028_s24 = smov 128   ;;  %s2029_s25 = smov 8  }
  0x25   : > { %s2413_s2 = sld [smem:[#allocation20_spill]]  ;;  %s1834_s16 = scalar_lea.vmem %s282_s20, 512 }
  0x26   : > { %p1835_p1 = scmp.ne.s32.totalorder %s282_s20, %s1834_s16  ;;  %p1842_p2 = scmp.lt.s32.totalorder %s282_s20, %s282_s20 }
  0x27   : > { %p1843_p6 = scmp.lt.s32.totalorder %s1834_s16, %s1834_s16 }
  0x28   : > { %p1837_p13 = pnand %p1835_p1, %p1799_p12 }
  0x29   : > { %p1844_p5 = por %p1843_p6, %p1842_p2 }
  0x2a   : > { %p1838_p0 = pneg %p1837_p13 }
  0x2b   : > { %1685 = dma.hbm_to_vmem [thread:$0]  (!%p2146_p11), %s2413_s2, 512, %s266_s17, [#allocation6], %s2028_s24, %s2028_s24, %s2029_s25  }
  0x2c   : > { %p1845_p3 = pnand %p1844_p5, %p1838_p0 }
  0x2e   : > { %1848 = shalt.err (!%p1845_p3)
}
  0x2f   : > { %s2414_s4 = sld [smem:[#allocation21_spill]]  ;;  %s1860_s17 = scalar_lea.vmem %s298_s22, 512 }
  0x30   : > { %p1861_p10 = scmp.ne.s32.totalorder %s298_s22, %s1860_s17  ;;  %p1868_p9 = scmp.lt.s32.totalorder %s298_s22, %s298_s22 }
  0x31   : > { %p1869_p13 = scmp.lt.s32.totalorder %s1860_s17, %s1860_s17 }
  0x32   : > { %p1863_p7 = pnand %p1861_p10, %p1799_p12 }
  0x33   : > { %p1870_p4 = por %p1869_p13, %p1868_p9 }
  0x34   : > { %p1864_p1 = pneg %p1863_p7 }
  0x35   : > { %1688 = dma.hbm_to_vmem [thread:$0]  (!%p2146_p11), %s2414_s4, 512, %s282_s20, [#allocation9], %s2028_s24, %s2028_s24, %s2029_s25  }
  0x36   : > { %p1871_p2 = pnand %p1870_p4, %p1864_p1 }
  0x38   : > { %1874 = shalt.err (!%p1871_p2)
}
  0x39   : > { %s2415_s6 = sld [smem:[#allocation22_spill]]  ;;  %s49_s20 = sadd.s32 1, %s2011_s29 }
  0x3a   : > { %s40_s12 = sadd.s32 1, %s2019_s9  ;;  %p56_p4 = scmp.ne.s32.totalorder %s2011_s29, %s2007_s28 }
  0x3b   : > { %p42_p6 = scmp.ge.s32.totalorder %s40_s12, 2  ;;  %p57_p12 = scmp.eq.s32.totalorder %s2023_s10, 0 }
  0x3c   : > { %p2416_p0 = scmp.eq.s32.totalorder %s2118_s11, 1  ;;  %p1706_p3 = scmp.lt.s32.totalorder %s2023_s10, 2 }
  0x3d   : > { %s2436_s12 = smov (%p42_p6, %s40_s12), 0  ;;  %p58_p10 = por %p57_p12, %p56_p4 }
  0x3e   : > { %p2183_p5 = por %p2416_p0, %p56_p4  ;;  %2418 = sst [smem:[#allocation18_spill]] %s2436_s12 }
  0x3f   : > { %1691 = dma.hbm_to_vmem [thread:$0]  (!%p2146_p11), %s2415_s6, 512, %s298_s22, [#allocation9], %s2028_s24, %s2028_s24, %s2029_s25  }
  0x40   : > { %s314_s16 = sand.u32 1, %s2011_s29   ;;  %s44_s19 = ssub.s32 %s2019_s9, %s2436_s12 }
  0x41   : > { %p47_p11 = scmp.eq.s32.totalorder %s44_s19, 0  ;;  %s1527_s22 = sshll.u32 %s314_s16, 3 }
  0x42   : > { %s1528_s24 = sshll.u32 %s2019_s9, 7  ;;  %s2419_s0 = sld [smem:[#allocation19_spill]] }
  0x43   : > { %s2195_s25 = scalar_select %p47_p11, %s2011_s29, %s49_s20  }
  0x44   : > { %s318_s26 = scalar_lea.vmem [#allocation2], %s1527_s22  ;;  %p2202_p7 = pnand %p1706_p3, %p58_p10 }
  0x45   : > { %s326_s2 = sshll.u32 %s318_s26, 4  ;;  %s2209_s19 = scalar_lea.hbm %s2392_s1, %s1528_s24  ;;  %s327_s2 = int_to_ptr.vmem [resolvable:$true] %s326_s2 }
  0x46   : > { %s333_s20 = sand.u32 1, %s2023_s10   ;;  %s315_s12 = scalar_lea.sflag [#allocation3], %s314_s16 }
  0x47   : > { %p1877_p1 = pneg %p2202_p7  ;;  %s1888_s21 = scalar_lea.vmem %s327_s2, 128 }
  0x48   : > { %s324_s23 = scalar_lea.hbm %s2419_s0, %s1528_s24  ;;  %p1889_p9 = scmp.ne.s32.totalorder %s327_s2, %s1888_s21 }
  0x49   : > { %s2030_s17 = smov [#allocation2]  }
  0x4a   : > { %p1891_p13 = pnand %p1889_p9, %p1877_p1  ;;  %s1893_s26 = sshll.u32 %s2030_s17, 4  ;;  %s1894_s26 = int_to_ptr.vmem [resolvable:$false] %s1893_s26 }
  0x4b   : > { %s1895_s0 = scalar_lea.vmem %s1894_s26, 256  ;;  %p1896_p4 = scmp.lt.s32.totalorder %s327_s2, %s1894_s26 }
  0x4c   : > { %p1892_p2 = pneg %p1891_p13  ;;  %p1897_p6 = scmp.lt.s32.totalorder %s1895_s0, %s1888_s21 }
  0x4e   : > { %p1898_p12 = por %p1897_p6, %p1896_p4 }
  0x50   : > { %p1899_p0 = pnand %p1898_p12, %p1892_p2 }
  0x52   : > { %1902 = shalt.err (!%p1899_p0)
}
  0x53   : > { %1695 = dma.hbm_to_vmem [thread:$0]  (!%p2202_p7), %s324_s23, 128, %s327_s2, %s315_s12  }
  0x54   : > { %s337_s6 = scalar_lea.vmem [#allocation5], %s1527_s22  ;;  %s334_s16 = scalar_lea.sflag [#allocation6], %s333_s20 }
  0x55   : > { %s344_s14 = sshll.u32 %s337_s6, 4  ;;  %s2031_s17 = smov [#allocation5]   ;;  %s345_s14 = int_to_ptr.vmem [resolvable:$true] %s344_s14 }
  0x56   : > { %s1916_s24 = scalar_lea.vmem %s345_s14, 128  ;;  %s1921_s26 = sshll.u32 %s2031_s17, 4  ;;  %s1922_s26 = int_to_ptr.vmem [resolvable:$false] %s1921_s26 }
  0x57   : > { %p1917_p3 = scmp.ne.s32.totalorder %s345_s14, %s1916_s24  ;;  %s1923_s0 = scalar_lea.vmem %s1922_s26, 256 }
  0x58   : > { %p1924_p9 = scmp.lt.s32.totalorder %s345_s14, %s1922_s26  ;;  %p1925_p13 = scmp.lt.s32.totalorder %s1923_s0, %s1916_s24 }
  0x59   : > { %p1919_p10 = pnand %p1917_p3, %p1877_p1 }
  0x5a   : > { %p1926_p2 = por %p1925_p13, %p1924_p9 }
  0x5b   : > { %p1920_p11 = pneg %p1919_p10 }
  0x5d   : > { %p1927_p4 = pnand %p1926_p2, %p1920_p11 }
  0x5f   : > { %1930 = shalt.err (!%p1927_p4)
}
  0x60   : > { %1698 = dma.hbm_to_vmem [thread:$0]  (!%p2202_p7), %s2209_s19, 128, %s345_s14, %s334_s16  }
  0x61   : > { %353 = sbr.rel (%p2137_p8) target bundleno = 1317 (0x525), region = 52  ;;  %s2228_s2 = sand.u32 (!%p2137_p8), 1, %s2007_s28  }
  0x62   : > { %s2231_s12 = sshll.u32 (!%p2137_p8), %s2228_s2, 3  ;;  %s356_s22 = scalar_lea.sflag (!%p2137_p8), [#allocation3], %s2228_s2 }
  0x63   : > { %s359_s23 = scalar_lea.vmem (!%p2137_p8), [#allocation2], %s2231_s12  ;;  %p2421_p1 = scmp.ne.s32.totalorder (!%p2137_p8), %s2408_s13, 0 }
  0x66   : > { %1982 = dma.done.wait (%p2421_p1), %s356_s22, 128  }
  0x67   : > { %1984 = vsyncadd (%p2421_p1), %s356_s22, 4294967168  ;;  %s364_s4 = sand.u32 1, %s2118_s11   ;;  %s368_s19 = scalar_lea.vmem [#allocation5], %s2231_s12 }
  0x68   : > { %s365_s15 = scalar_lea.sflag [#allocation6], %s364_s4 }
  0x69   : > { %1986 = dma.done.wait (%p2421_p1), %s365_s15, 128  }
  0x6a   : > { %1988 = vsyncadd (%p2421_p1), %s365_s15, 4294967168  ;;  %p2422_p8 = scmp.eq.s32.totalorder %s2118_s11, 0 }
  0x6c   : > { %1990 = dma.done.wait (%p2422_p8), [#allocation6], 512   ;;  %p2423_p7 = pmov %p2422_p8 }
  0x6e   : > { %1992 = vsyncadd (%p2423_p7), [#allocation6], 4294966784  ;;  %p2424_p6 = pmov %p2423_p7 }
  0x70   : > { %1994 = dma.done.wait (%p2424_p6), [#allocation9], 1024   ;;  %p2425_p12 = pmov %p2424_p6 }
  0x71   : > { %v2032_v0 = vmov 0.0   ;;  %vm2033_vm0 = vmmov 0   ;;  %v515_v1 = vld [vmem:[#allocation8 + $0x18] sm:$0xff]  ;;  %v514_v3 = vld [vmem:[#allocation8 + $0x10] sm:$0xff]  ;;  %v513_v5 = vld [vmem:[#allocation8 + $0x8] sm:$0xff]  ;;  %vm430_vm1 = vcmask 261120  }
  0x72   : > { %1996 = vsyncadd (%p2425_p12), [#allocation9], 4294966272  ;;  %1602 = vmatprep.subr.mxu1 %v2032_v0  ;;  %1591 = vmatprep.subr.mxu0 %v2032_v0  ;;  %v422_v2 = vld [vmem:[#allocation7 + $0x18] sm:$0xff]  ;;  %v421_v4 = vld [vmem:[#allocation7 + $0x10] sm:$0xff]  ;;  %vm603_vm2 = vcmask 64512   ;;  %s2034_s6 = smov 112  }
  0x73   : > { %1610 = vmatprep.mubr.msk.f32.mxu1 %vm2033_vm0, %v2032_v0  ;;  %1599 = vmatprep.mubr.msk.f32.mxu0 %vm2033_vm0, %v2032_v0  ;;  %v420_v6 = vld [vmem:[#allocation7 + $0x8] sm:$0xff]  ;;  %v512_v7 = vld [vmem:[#allocation8] sm:$0xff]  ;;  %v511_v9 = vld [vmem:[%s368_s19] sm:$0xff]  ;;  %s2035_s14 = smov 120   ;;  %s2036_s16 = smov 104   ;;  %vm1285_vm3 = vcmask 130048  }
  0x74   : > { %1603 = vmatpush3.msra.mxu1 %v515_v1  ;;  %1592 = vmatpush3.msra.mxu0 %v422_v2  ;;  %v419_v8 = vld [vmem:[#allocation7] sm:$0xff]  ;;  %s2037_s24 = smov 96   ;;  %s2038_s17 = smov 8   ;;  %vm1287_vm4 = vcmask 195584  }
  0x75   : > { %1604 = vmatprep.subr.mxu1 %v2032_v0  ;;  %1593 = vmatprep.subr.mxu0 %v2032_v0  ;;  %v418_v10 = vld [vmem:[%s359_s23] sm:$0xff]  ;;  %s2039_s26 = smov 16   ;;  %s2040_s0 = smov 24  }
  0x76   : > { %1605 = vmatpush3.msra.mxu1 %v514_v3  ;;  %1594 = vmatpush3.msra.mxu0 %v421_v4  ;;  %v1540_v11 = vld [vmem:[%s2396_s5] ss:$0 sm:$0xff]  ;;  %s1557_s4 = sshll.u32 %s2015_s30, 7  ;;  %s417_s15 = scalar_lea.vmem [#allocation11], %s2231_s12 }
  0x77   : > { %1606 = vmatprep.subr.mxu1 %v2032_v0  ;;  %1595 = vmatprep.subr.mxu0 %v2032_v0  ;;  %v1538_v13 = vld [vmem:[%s2394_s3] ss:$0 sm:$0xff]  ;;  %s1389_s19 = sshll.u32 %s417_s15, 4  ;;  %s2348_s20 = scalar_lea.hbm %s2399_s8, %s1557_s4  ;;  %s1390_s19 = int_to_ptr.vmem [resolvable:$true] %s1389_s19 }
  0x78   : > { %1607 = vmatpush3.msra.mxu1 %v513_v5  ;;  %1596 = vmatpush3.msra.mxu0 %v420_v6  ;;  %s1375_s21 = scalar_lea.sflag [#allocation4], %s2228_s2  ;;  %s2041_s30 = smov [#allocation11]  }
  0x79   : > { %1608 = vmatprep.subr.mxu1 %v2032_v0  ;;  %1597 = vmatprep.subr.mxu0 %v2032_v0  ;;  %s1935_s12 = sshll.u32 %s2041_s30, 4  ;;  %s1936_s12 = int_to_ptr.vmem [resolvable:$false] %s1935_s12 }
  0x7a   : > { %1609 = vmatpush3.msra.mxu1 %v512_v7  ;;  %1598 = vmatpush3.msra.mxu0 %v419_v8  ;;  %p1938_p11 = scmp.lt.s32.totalorder %s1390_s19, %s1936_s12 }
  0x7b   : > { %1611 = vmatmul.mubr.msk.f32.vlgmr.msra.gmra.mxu1 %vm430_vm1, %v511_v9  ;;  %1600 = vmatmul.mubr.msk.f32.vlgmr.msra.gmra.mxu0 %vm430_vm1, %v418_v10 }
  0x7c   : > { %1613 = vmatprep.subr.mxu1 %v2032_v0  ;;  %1615 = vmatprep.mubr.msk.f32.mxu1 %vm2033_vm0, %v2032_v0 }
  0x7d   : > { %1623 = vmatprep.subr.mxu0 %v2032_v0  ;;  %1625 = vmatprep.mubr.msk.f32.mxu0 %vm2033_vm0, %v2032_v0 }
 0x13b   : > { %v592_v12 = vpop.f32.mrf.mxu1  ;;  %v500_v14 = vpop.f32.mrf.mxu0 }
 0x13c   : > { %v593_v15 = vadd.f32 %v1540_v11, %v592_v12  ;;  %v501_v18 = vadd.f32 %v1538_v13, %v500_v14 }
 0x13d   : > { %v1612_v16 = vpop.f32.mrf.mxu1  ;;  %v1601_v17 = vpop.f32.mrf.mxu0 }
 0x13e   : > { %599 = vrot.lane.b32.xlu1 %v593_v15, %s2034_s6  ;;  %597 = vrot.lane.b32.xlu0 %v593_v15, %s2035_s14  ;;  %v1292_v17 = vld [vmem:[#allocation10 + $0x18] sm:$0xff] }
 0x13f   : > { %1614 = vmatpush3.xpose.msk.msra.mxu1 %vm603_vm2, %v593_v15 }
 0x140   : > { %1618 = vmatprep.subr.mxu1 %v2032_v0 }
 0x142   : > { %1616 = vmatmul.mubr.msk.f32.vlgmr.msra.gmra.mxu1 %vm603_vm2, %v501_v18  ;;  %601 = vrot.lane.b32.xlu1 %v593_v15, %s2036_s16 }
 0x143   : > { %505 = vrot.lane.b32.xlu0 %v501_v18, %s2035_s14  ;;  %1620 = vmatprep.mubr.msk.f32.mxu1 %vm2033_vm0, %v2032_v0  ;;  %s1937_s14 = scalar_lea.vmem %s1936_s12, 256 }
 0x146   : > { %509 = vrot.lane.b32.xlu1 %v501_v18, %s2036_s16 }
 0x147   : > { %507 = vrot.lane.b32.xlu0 %v501_v18, %s2034_s6  ;;  %s1931_s6 = scalar_lea.vmem %s1390_s19, 128 }
 0x148   : > { %p1932_p0 = scmp.ne.s32.totalorder %s1390_s19, %s1931_s6  ;;  %p1939_p9 = scmp.lt.s32.totalorder %s1937_s14, %s1931_s6 }
 0x14a   : > { %956 = vrot.lane.b32.xlu1 %v593_v15, %s2037_s24  ;;  %p1933_p3 = pnand %p1932_p0, %p2183_p5  ;;  %p1940_p13 = por %p1939_p9, %p1938_p11 }
 0x14c   : > { %p1934_p10 = pneg %p1933_p3 }
 0x14e   : > { %p1941_p2 = pnand %p1940_p13, %p1934_p10 }
 0x1b0   : > { %v600_v19 = vpop.permute.xlu1 %599  ;;  %v598_v20 = vpop.permute.xlu0 %597 }
 0x1b1   : > { %1619 = vmatpush3.xpose.msk.msra.mxu1 %vm603_vm2, %v598_v20  ;;  %1624 = vmatpush3.xpose.msk.msra.mxu0 %vm603_vm2, %v600_v19 }
 0x1b2   : > { %1628 = vmatprep.subr.mxu1 %v2032_v0  ;;  %1633 = vmatprep.subr.mxu0 %v2032_v0 }
 0x1b4   : > { %v602_v21 = vpop.permute.xlu1 %601 }
 0x1b5   : > { %v506_v22 = vpop.permute.xlu0 %505 }
 0x1b6   : > { %1621 = vmatmul.mubr.msk.f32.vlgmr.msra.gmra.mxu1 %vm603_vm2, %v506_v22  ;;  %v1289_v22 = vld [vmem:[#allocation10] sm:$0xff] }
 0x1b7   : > { %1629 = vmatpush3.xpose.msk.msra.mxu1 %vm603_vm2, %v602_v21  ;;  %1630 = vmatprep.mubr.msk.f32.mxu1 %vm2033_vm0, %v2032_v0 }
 0x1b8   : > { %v510_v23 = vpop.permute.xlu1 %509  ;;  %1638 = vmatprep.subr.mxu1 %v2032_v0 }
 0x1b9   : > { %v508_v24 = vpop.permute.xlu0 %507 }
 0x1ba   : > { %1626 = vmatmul.mubr.msk.f32.vlgmr.msra.gmra.mxu0 %vm603_vm2, %v508_v24  ;;  %1631 = vmatmul.mubr.msk.f32.vlgmr.msra.gmra.mxu1 %vm603_vm2, %v510_v23 }
 0x1bb   : > { %1635 = vmatprep.mubr.msk.f32.mxu0 %vm2033_vm0, %v2032_v0  ;;  %1640 = vmatprep.mubr.msk.f32.mxu1 %vm2033_vm0, %v2032_v0 }
 0x1bc   : > { %v957_v25 = vpop.permute.xlu1 %956 }
 0x1bd   : > { %1634 = vmatpush3.msra.mxu0 %v957_v25 }
 0x1be   : > { %1643 = vmatprep.subr.mxu0 %v2032_v0 }
 0x202   : > { %v674_v26 = vpop.f32.mrf.mxu1 }
 0x203   : > { %v900_v27 = vsel %vm603_vm2, %v674_v26, -inf }
 0x204   : > { %901 = vmax.xlane.f32.xlu0 %v900_v27  ;;  %v1617_v28 = vpop.f32.mrf.mxu1 }
 0x276   : > { %v748_v29 = vpop.f32.mrf.mxu1 }
 0x277   : > { %v903_v30 = vsel %vm603_vm2, %v748_v29, -inf }
 0x278   : > { %904 = vmax.xlane.f32.xlu1 %v903_v30  ;;  %v1622_v31 = vpop.f32.mrf.mxu1 }
 0x27a   : > { %v822_v32 = vpop.f32.mrf.mxu0  ;;  %v896_v33 = vpop.f32.mrf.mxu1 }
 0x27b   : > { %v906_v34 = vsel %vm603_vm2, %v822_v32, -inf  ;;  %v909_v37 = vsel %vm603_vm2, %v896_v33, -inf }
 0x27c   : > { %v1632_v35 = vpop.f32.mrf.mxu1  ;;  %907 = vmax.xlane.f32.xlu0 %v906_v34  ;;  %v1627_v36 = vpop.f32.mrf.mxu0 }
 0x280   : > { %910 = vmax.xlane.f32.xlu0 %v909_v37 }
 0x289   : > { %1108 = vrot.lane.b32.xlu1 %v600_v19, %s2037_s24  ;;  %v1291_v19 = vld [vmem:[#allocation10 + $0x10] sm:$0xff] }
 0x28d   : > { %v2310_v38 = vpop.xlane.xlu0 %901  ;;  %1184 = vrot.lane.b32.xlu1 %v602_v21, %s2037_s24 }
 0x28e   : > { %v924_v39 = vsub.f32 %v674_v26, %v2310_v38  ;;  %v912_v36 = vsub.f32 -inf, %v2310_v38 }
 0x290   : > { %v928_v40 = vmul.f32 1.442695, %v924_v39  ;;  %v916_v37 = vmul.f32 1.442695, %v912_v36 }
 0x292   : > { %1773 = vpow2.f32 %v928_v40 }
 0x296   : > { %1032 = vrot.lane.b32.xlu0 %v598_v20, %s2037_s24  ;;  %v1290_v20 = vld [vmem:[#allocation10 + $0x8] sm:$0xff] }
 0x29f   : > { %v1774_v41 = vpop.eup %1773 }
 0x2a0   : > { %1636 = vmatmul.mubr.msk.f32.vlgmr.msra.gmra.mxu0 %vm603_vm2, %v1774_v41  ;;  %v940_v60 = vsel %vm603_vm2, %v1774_v41, 0.0 }
 0x2a1   : > { %1645 = vmatprep.mubr.msk.f32.mxu0 %vm2033_vm0, %v2032_v0 }
 0x301   : > { %v905_v42 = vpop.xlane.xlu1 %904 }
 0x302   : > { %v925_v43 = vsub.f32 %v748_v29, %v905_v42  ;;  %v913_v63 = vsub.f32 -inf, %v905_v42 }
 0x304   : > { %v930_v44 = vmul.f32 1.442695, %v925_v43  ;;  %v918_v1 = vmul.f32 1.442695, %v913_v63 }
 0x305   : > { %v1109_v45 = vpop.permute.xlu1 %1108  ;;  %v908_v46 = vpop.xlane.xlu0 %907 }
 0x306   : > { %v926_v47 = vsub.f32 %v822_v32, %v908_v46  ;;  %1644 = vmatpush3.msra.mxu0 %v1109_v45  ;;  %1775 = vpow2.f32 %v930_v44  ;;  %v914_v2 = vsub.f32 -inf, %v908_v46 }
 0x307   : > { %1653 = vmatprep.subr.mxu0 %v2032_v0 }
 0x308   : > { %v932_v48 = vmul.f32 1.442695, %v926_v47  ;;  %v920_v3 = vmul.f32 1.442695, %v914_v2 }
 0x309   : > { %v911_v49 = vpop.xlane.xlu0 %910  ;;  %v1185_v54 = vpop.permute.xlu1 %1184 }
 0x30a   : > { %v927_v50 = vsub.f32 %v896_v33, %v911_v49  ;;  %1777 = vpow2.f32 %v932_v48  ;;  %v915_v4 = vsub.f32 -inf, %v911_v49 }
 0x30c   : > { %v934_v51 = vmul.f32 1.442695, %v927_v50  ;;  %v922_v5 = vmul.f32 1.442695, %v915_v4 }
 0x30d   : > { %v1033_v52 = vpop.permute.xlu0 %1032 }
 0x30e   : > { %1639 = vmatpush3.msra.mxu1 %v1033_v52  ;;  %1779 = vpow2.f32 %v934_v51  ;;  %v1554_v51 = vld [vmem:[%s2398_s7] ss:$0 sm:$0xff] }
 0x30f   : > { %1648 = vmatprep.subr.mxu1 %v2032_v0  ;;  %1781 = vpow2.f32 %v918_v1 }
 0x310   : > { %1783 = vpow2.f32 %v920_v3 }
 0x311   : > { %1785 = vpow2.f32 %v922_v5 }
 0x313   : > { %v1776_v53 = vpop.eup %1775 }
 0x314   : > { %1641 = vmatmul.mubr.msk.f32.vlgmr.msra.gmra.mxu1 %vm603_vm2, %v1776_v53  ;;  %v943_v55 = vsel %vm603_vm2, %v1776_v53, 0.0 }
 0x315   : > { %1649 = vmatpush3.msra.mxu1 %v1185_v54  ;;  %944 = vadd.xlane.f32.xlu0 %v943_v55 }
 0x316   : > { %1650 = vmatprep.mubr.msk.f32.mxu1 %vm2033_vm0, %v2032_v0 }
 0x317   : > { %v1778_v56 = vpop.eup %1777 }
 0x318   : > { %1646 = vmatmul.mubr.msk.f32.vlgmr.msra.gmra.mxu0 %vm603_vm2, %v1778_v56  ;;  %v946_v57 = vsel %vm603_vm2, %v1778_v56, 0.0 }
 0x319   : > { %947 = vadd.xlane.f32.xlu1 %v946_v57  ;;  %1661 = vmatprep.mubr.msk.f32.mxu0 %vm2033_vm0, %v2032_v0 }
 0x31a   : > { %1654 = vmatpush3.msra.mxu0 %v1292_v17 }
 0x31b   : > { %v1780_v58 = vpop.eup %1779  ;;  %1655 = vmatprep.subr.mxu0 %v2032_v0 }
 0x31c   : > { %1651 = vmatmul.mubr.msk.f32.vlgmr.msra.gmra.mxu1 %vm603_vm2, %v1780_v58  ;;  %v949_v59 = vsel %vm603_vm2, %v1780_v58, 0.0  ;;  %v1782_v6 = vpop.eup %1781  ;;  %1656 = vmatpush3.msra.mxu0 %v1291_v19 }
 0x31d   : > { %950 = vadd.xlane.f32.xlu0 %v949_v59  ;;  %v937_v8 = vmul.f32 0.0, %v1782_v6  ;;  %v1784_v9 = vpop.eup %1783  ;;  %1657 = vmatprep.subr.mxu0 %v2032_v0 }
 0x31e   : > { %v938_v12 = vmul.f32 0.0, %v1784_v9  ;;  %v1786_v13 = vpop.eup %1785  ;;  %1658 = vmatpush3.msra.mxu0 %v1290_v20 }
 0x31f   : > { %v939_v16 = vmul.f32 0.0, %v1786_v13  ;;  %1659 = vmatprep.subr.mxu0 %v2032_v0 }
 0x320   : > { %1660 = vmatpush3.msra.mxu0 %v1289_v22 }
 0x321   : > { %941 = vadd.xlane.f32.xlu0 %v940_v60 }
 0x360   : > { %v2331_v61 = vpop.f32.mrf.mxu0 }
 0x362   : > { %v1637_v62 = vpop.f32.mrf.mxu0 }
 0x39e   : > { %v945_v7 = vpop.xlane.xlu0 %944 }
 0x39f   : > { %v953_v10 = vadd.f32 %v945_v7, %v937_v8 }
 0x3a1   : > { %1787 = vrcp.f32 %v953_v10 }
 0x3a2   : > { %v948_v11 = vpop.xlane.xlu1 %947 }
 0x3a3   : > { %v954_v14 = vadd.f32 %v948_v11, %v938_v12 }
 0x3a5   : > { %1789 = vrcp.f32 %v954_v14 }
 0x3a6   : > { %v951_v15 = vpop.xlane.xlu0 %950 }
 0x3a7   : > { %v955_v18 = vadd.f32 %v951_v15, %v939_v16 }
 0x3a9   : > { %1791 = vrcp.f32 %v955_v18 }
 0x3aa   : > { %1793 = vpow2.f32 %v916_v37  ;;  %v942_v40 = vpop.xlane.xlu0 %941 }
 0x3ae   : > { %v1788_v24 = vpop.eup %1787 }
 0x3b2   : > { %v1790_v29 = vpop.eup %1789 }
 0x3b6   : > { %v1792_v34 = vpop.eup %1791 }
 0x3b7   : > { %v1794_v39 = vpop.eup %1793 }
 0x3b8   : > { %v936_v41 = vmul.f32 0.0, %v1794_v39 }
 0x3ba   : > { %v952_v42 = vadd.f32 %v942_v40, %v936_v41  ;;  %v1260_v44 = vadd.f32 %v2331_v61, %v936_v41 }
 0x3bc   : > { %1795 = vrcp.f32 %v952_v42 }
 0x3c9   : > { %v1796_v43 = vpop.eup %1795 }
 0x3ca   : > { %v1268_v46 = vmul.f32 %v1796_v43, %v1260_v44 }
 0x3d4   : > { %v1104_v21 = vpop.f32.mrf.mxu1 }
 0x3d5   : > { %v1261_v23 = vadd.f32 %v1104_v21, %v937_v8 }
 0x3d6   : > { %v1642_v25 = vpop.f32.mrf.mxu1 }
 0x3d7   : > { %v1269_v26 = vmul.f32 %v1788_v24, %v1261_v23 }
 0x3d8   : > { %v1180_v27 = vpop.f32.mrf.mxu0 }
 0x3d9   : > { %v1262_v28 = vadd.f32 %v1180_v27, %v938_v12  ;;  %1273 = vrot.lane.b32.xlu1 %v1269_v26, %s2038_s17 }
 0x3da   : > { %v1647_v30 = vpop.f32.mrf.mxu0 }
 0x3db   : > { %v1270_v31 = vmul.f32 %v1790_v29, %v1262_v28 }
 0x3dc   : > { %v1256_v32 = vpop.f32.mrf.mxu1 }
 0x3dd   : > { %v1263_v33 = vadd.f32 %v1256_v32, %v939_v16  ;;  %1277 = vrot.lane.b32.xlu0 %v1270_v31, %s2039_s26 }
 0x3de   : > { %v1652_v35 = vpop.f32.mrf.mxu1 }
 0x3df   : > { %v1271_v0 = vmul.f32 %v1792_v34, %v1263_v33 }
 0x3e1   : > { %1281 = vrot.lane.b32.xlu1 %v1271_v0, %s2040_s0 }
 0x44b   : > { %v1274_v45 = vpop.permute.xlu1 %1273 }
 0x44c   : > { %v1284_v38 = vsel %vm603_vm2, %v1268_v46, %v1274_v45 }
 0x44f   : > { %v1278_v47 = vpop.permute.xlu0 %1277 }
 0x450   : > { %v1286_v48 = vsel %vm1285_vm3, %v1284_v38, %v1278_v47 }
 0x453   : > { %v1282_v49 = vpop.permute.xlu1 %1281 }
 0x454   : > { %v1288_v50 = vsel %vm1287_vm4, %v1286_v48, %v1282_v49 }
 0x455   : > { %1662 = vmatmul.mubr.msk.f32.vlgmr.msra.gmra.mxu0 %vm430_vm1, %v1288_v50 }
 0x515   : > { %v1369_v52 = vpop.f32.mrf.mxu0 }
 0x516   : > { %v1370_v53 = vadd.f32 %v1554_v51, %v1369_v52 }
 0x517   : > { %v1663_v54 = vpop.f32.mrf.mxu0 }
 0x518   : > { %1373 = vst.msk [vmem:[%s417_s15] sm:$0xff] %vm430_vm1, %v1370_v53 }
 0x519   : > { %1944 = shalt.err (!%p1941_p2)
}
 0x51a   : > { %s1945_s16 = scalar_lea.hbm %s2348_s20, 128  ;;  %s1949_s17 = scalar_lea.hbm %s2399_s8, 256 }
 0x51b   : > { %p1946_p4 = scmp.ne.s32.totalorder %s2348_s20, %s1945_s16  ;;  %p1950_p7 = scmp.lt.s32.totalorder %s2348_s20, %s2399_s8 }
 0x51c   : > { %p1951_p6 = scmp.lt.s32.totalorder %s1949_s17, %s1945_s16 }
 0x51d   : > { %p1947_p1 = pnand %p1946_p4, %p2183_p5 }
 0x51e   : > { %p1952_p12 = por %p1951_p6, %p1950_p7 }
 0x51f   : > { %p1948_p8 = pneg %p1947_p1 }
 0x521   : > { %p1953_p0 = pnand %p1952_p12, %p1948_p8 }
 0x523   : > { %1956 = shalt.err (!%p1953_p0)
}
 0x524   : > { %1680 = dma.vmem_to_hbm [thread:$0]  (%p2183_p5), %s1390_s19, 128, %s2348_s20, %s1375_s21  }
 0x525 PF: > { %s2426_s22 = sld [smem:[#allocation17_spill]]  ;;  %s1401_s23 = sand.u32 1, %s2003_s27  }
 0x526   : > { %p2428_p10 = scmp.ge.s32.totalorder %s2023_s10, 2  ;;  %s1402_s4 = scalar_lea.sflag [#allocation4], %s1401_s23 }
 0x52b   : > { %p2427_p3 = scmp.ne.s32.totalorder %s2426_s22, 0 }
 0x52d   : > { %p1700_p11 = pnand %p2428_p10, %p2427_p3 }
 0x52f   : > { %p1701_p9 = pneg %p1700_p11 }
 0x531   : > { %1998 = dma.done.wait (%p1701_p9), %s1402_s4, 128  }
 0x532   : > { %2000 = vsyncadd (%p1701_p9), %s1402_s4, 4294967168  ;;  %s28_s10 = sadd.s32 1, %s2023_s10   ;;  %s2429_s18 = sld [smem:[#allocation18_spill]] }
 0x533   : > { %p25_p13 = scmp.ge.s32.totalorder %s28_s10, 4   ;;  %s2430_s27 = smov %s2007_s28 }
 0x534   : > { %s2431_s28 = smov %s2011_s29  ;;  %s2432_s29 = smov %s2195_s25 }
 0x535   : > { %s2433_s30 = smov %s2019_s9  ;;  %27 = sbr.rel (!%p25_p13) target bundleno = 14 (0xe), region = 122 }
 0x538   : > { %s2434_s9 = smov %s2429_s18 }
 0x53a   :  { %1407 = vsyncpa [#allocation3], 1 }
 0x53b   :  { %1409 = vsyncpa [#allocation3 + $0x1], 1 }
 0x53c   :  { %1410 = vsyncpa [#allocation6], 1 }
 0x53d   :  { %1412 = vsyncpa [#allocation6 + $0x1], 1 }
 0x53e   :  { %1413 = vsyncpa [#allocation9], 1 }
 0x53f   :  { %1414 = vsyncpa [#allocation4], 1 }
 0x540   :  { %1416 = vsyncpa [#allocation4 + $0x1], 1 }

</bundles_post_ra>
